<compile_context>
chip_gen: v7x
topology: tpu7x:2x2x1
jax: 0.10.0
libtpu: 0.0.40
codegen_flags: <defaults>
</compile_context>

<pallas_src>
import jax
import jax.numpy as jnp
from jax import lax
from jax.experimental import pallas as pl
from jax.experimental.pallas import tpu as pltpu

# ---- module hyper-parameters (small, consistent with the PyTorch module) ----
CHANNELS = 8
HALF = CHANNELS // 2          # 4
HIDDEN = 32                   # hidden_channels
KSIZE = 5                     # kernel_size (odd, as asserted)
DIL_RATE = 2                  # dilation_rate
N_LAYERS = 3                  # n_layers
GIN = 16                      # gin_channels (must be != 0, WN uses cond_layer)
B = 2
T = 128


def coupling_kernel(x_ref, mask_ref, g_ref,
                    pc_w_ref, pc_b_ref,
                    inw_ref, rs_w_ref, rs_b_ref,
                    post_w_ref, post_b_ref,
                    out_ref, stacked_ref):
    f32 = jnp.float32
    mask = mask_ref[...]          # (1, T)
    x0 = x_ref[:HALF, :]          # (HALF, T)  -- pass-through half
    x1 = x_ref[HALF:, :]          # (HALF, T)  -- transformed half
    g = g_ref[...]                # (GIN, T)

    # Hoisted per-shift validity masks, one (1, T) row each (broadcast over the
    # HIDDEN rows inside the where).  Only 8 distinct shifts exist (+-1, +-2,
    # +-4, +-8); they implement the conv zero-padding at the sequence edges.
    t_idx = lax.broadcasted_iota(jnp.int32, (1, T), 1)
    shift_mask = {}
    for li in range(N_LAYERS):
        dil = DIL_RATE ** li
        for k in range(KSIZE):
            s = (k - KSIZE // 2) * dil
            if s != 0 and s not in shift_mask:
                shift_mask[s] = (t_idx < T - s) if s > 0 else (t_idx >= -s)

    def shifted(h, s):
        """shifted[:, t] = h[:, t + s], zero outside [0, T)."""
        if s == 0:
            return h
        rolled = pltpu.roll(h, shift=(-s) % T, axis=1)
        return jnp.where(shift_mask[s], rolled, 0.0)

    # Fused pre + cond 1x1 convs: one (H + 2*H*L, HALF+GIN) x (HALF+GIN, T)
    # MXU matmul (block-diagonal weight built in prepare_params; in_layer
    # biases already folded into the cond bias rows).
    xg = jnp.concatenate([x0, g], axis=0)                        # (HALF+GIN, T)
    hg = (jnp.dot(pc_w_ref[...], xg, preferred_element_type=f32)
          + pc_b_ref[...])                                       # (H + 2HL, T)
    h = hg[:HIDDEN, :] * mask                                    # pre(x0)*mask
    cond = hg[HIDDEN:, :]                                        # cond(g)+in_b

    output = jnp.zeros((HIDDEN, T), f32)
    for i in range(N_LAYERS):                     # static unroll, N_LAYERS=3
        dil = DIL_RATE ** i
        # Fused dilated Conv1d: write each lane-shifted tap into its 32-row
        # band of the persistent scratch (sublane-aligned, unmasked stores),
        # then a single (2H, K*H) x (K*H, T) matmul.
        for k in range(KSIZE):
            s = (k - KSIZE // 2) * dil
            stacked_ref[k * HIDDEN:(k + 1) * HIDDEN, :] = shifted(h, s)
        z = (jnp.dot(inw_ref[i], stacked_ref[...], preferred_element_type=f32)
             + cond[i * 2 * HIDDEN:(i + 1) * 2 * HIDDEN, :])
        # fused_add_tanh_sigmoid_multiply (dropout p=0 -> identity)
        acts = jnp.tanh(z[:HIDDEN, :]) * jax.nn.sigmoid(z[HIDDEN:, :])
        if i < N_LAYERS - 1:
            rs = (jnp.dot(rs_w_ref[i], acts, preferred_element_type=f32)
                  + rs_b_ref[i])
            h = (h + rs[:HIDDEN, :]) * mask
            output = output + rs[HIDDEN:, :]
        else:
            # last res_skip layer: only HIDDEN meaningful output channels
            rs = (jnp.dot(rs_w_ref[i][:HIDDEN, :], acts,
                          preferred_element_type=f32)
                  + rs_b_ref[i][:HIDDEN, :])
            output = output + rs
    h_enc = output * mask

    # post: zero-initialized 1x1 conv (kept for exact semantics)
    stats = (jnp.dot(post_w_ref[...], h_enc, preferred_element_type=f32)
             + post_b_ref[...]) * mask
    # logs == 0 identically -> exp(logs) == 1; logdet == 0 (handled in wrapper)
    # Single unmasked (CHANNELS, T) = (8, 128) tile store: x0 pass-through in
    # rows 0..HALF-1, transformed x1 in rows HALF..CHANNELS-1.
    out_ref[...] = jnp.concatenate([x0, stats + x1 * mask], axis=0)


def prepare_params(p):
    """One-time param prep (analogue of remove_weight_norm): fold module
    parameters into the kernel-ready fused form."""
    # Dilated-conv weights (L, K, 2H, H) -> (L, 2H, K*H) for the fused
    # single-matmul-per-layer form.
    inw_flat = jnp.transpose(p["in_w"], (0, 2, 1, 3)).reshape(
        N_LAYERS, 2 * HIDDEN, KSIZE * HIDDEN)
    # Block-diagonal fusion of pre (H, HALF) and cond (2HL, GIN) 1x1 convs;
    # fold the in_layer biases into the cond bias rows.
    pc_w = jnp.zeros((HIDDEN + 2 * HIDDEN * N_LAYERS, HALF + GIN), jnp.float32)
    pc_w = pc_w.at[:HIDDEN, :HALF].set(p["pre_w"])
    pc_w = pc_w.at[HIDDEN:, HALF:].set(p["cond_w"])
    pc_b = jnp.concatenate(
        [p["pre_b"],
         p["cond_b"] + p["in_b"].reshape(2 * HIDDEN * N_LAYERS, 1)], axis=0)
    return {"pc_w": pc_w, "pc_b": pc_b, "inw": inw_flat,
            "rs_w": p["rs_w"], "rs_b": p["rs_b"],
            "post_w": p["post_w"], "post_b": p["post_b"]}


def residual_coupling_forward(x, x_mask, style_embed, kp):
    """x: (B, CHANNELS, T), x_mask: (B, 1, T), style_embed: (B, GIN, T)."""
    nb = x.shape[0]
    assert x.shape[1] == CHANNELS and x.shape[2] == T
    assert x_mask.shape == (nb, 1, T) and style_embed.shape == (nb, GIN, T)

    def seq_spec(c):   # per-batch block; batch dim squeezed out of the ref
        return pl.BlockSpec((None, c, T), lambda b: (b, 0, 0))

    def w_spec(shape):  # full-array weight block, constant index map
        return pl.BlockSpec(shape, lambda b, _nd=len(shape): (0,) * _nd)

    operands = (x, x_mask, style_embed,
                kp["pc_w"], kp["pc_b"], kp["inw"],
                kp["rs_w"], kp["rs_b"], kp["post_w"], kp["post_b"])
    in_specs = [seq_spec(CHANNELS), seq_spec(1), seq_spec(GIN)] + [
        w_spec(kp[k].shape)
        for k in ("pc_w", "pc_b", "inw", "rs_w", "rs_b", "post_w", "post_b")]

    x_out = pl.pallas_call(
        coupling_kernel,
        out_shape=jax.ShapeDtypeStruct((nb, CHANNELS, T), jnp.float32),
        grid_spec=pltpu.PrefetchScalarGridSpec(
            num_scalar_prefetch=0,
            grid=(nb,),
            in_specs=in_specs,
            out_specs=seq_spec(CHANNELS),
            scratch_shapes=[pltpu.VMEM((KSIZE * HIDDEN, T), jnp.float32)],
        ),
        compiler_params=pltpu.CompilerParams(
            dimension_semantics=("parallel",)),
    )(*operands)

    logdet = jnp.zeros((nb,), jnp.float32)   # sum(logs) with logs == 0
    return x_out, logdet


# ---------------------------- pure-JAX reference ----------------------------
def ref_forward(x, x_mask, g, p):
    x0, x1 = x[:, :HALF, :], x[:, HALF:, :]
    h = jnp.einsum("oi,bit->bot", p["pre_w"], x0) + p["pre_b"][None]
    h = h * x_mask
    cond = jnp.einsum("oi,bit->bot", p["cond_w"], g) + p["cond_b"][None]
    output = jnp.zeros_like(h)
    for i in range(N_LAYERS):
        dil = DIL_RATE ** i
        pad = dil * (KSIZE - 1) // 2
        w = jnp.transpose(p["in_w"][i], (1, 2, 0))          # (2H, H, K)
        x_in = lax.conv_general_dilated(
            h, w, window_strides=(1,), padding=[(pad, pad)],
            rhs_dilation=(dil,), dimension_numbers=("NCH", "OIH", "NCH"))
        x_in = x_in + p["in_b"][i][None]
        g_l = cond[:, i * 2 * HIDDEN:(i + 1) * 2 * HIDDEN, :]
        z = x_in + g_l
        acts = jnp.tanh(z[:, :HIDDEN]) * jax.nn.sigmoid(z[:, HIDDEN:])
        rs = jnp.einsum("oi,bit->bot", p["rs_w"][i], acts) + p["rs_b"][i][None]
        if i < N_LAYERS - 1:
            h = (h + rs[:, :HIDDEN]) * x_mask
            output = output + rs[:, HIDDEN:]
        else:
            output = output + rs[:, :HIDDEN]
    h_enc = output * x_mask
    stats = (jnp.einsum("oi,bit->bot", p["post_w"], h_enc)
             + p["post_b"][None]) * x_mask
    m = stats
    x1n = m + x1 * x_mask
    return (jnp.concatenate([x0, x1n], axis=1),
            jnp.zeros((x.shape[0],), jnp.float32))


def make_params(key):
    ks = jax.random.split(key, 8)
    return {
        # pre Conv1d(half -> hidden, k=1)
        "pre_w": 0.3 * jax.random.normal(ks[0], (HIDDEN, HALF), jnp.float32),
        "pre_b": 0.1 * jax.random.normal(ks[1], (HIDDEN, 1), jnp.float32),
        # WN cond Conv1d(gin -> 2*hidden*n_layers, k=1)
        "cond_w": 0.1 * jax.random.normal(ks[2], (2 * HIDDEN * N_LAYERS, GIN), jnp.float32),
        "cond_b": 0.1 * jax.random.normal(ks[3], (2 * HIDDEN * N_LAYERS, 1), jnp.float32),
        # WN in_layers: Conv1d(hidden -> 2*hidden, K, dilation=d^i); stored (L, K, 2H, H)
        "in_w": 0.1 * jax.random.normal(ks[4], (N_LAYERS, KSIZE, 2 * HIDDEN, HIDDEN), jnp.float32),
        "in_b": 0.1 * jax.random.normal(ks[5], (N_LAYERS, 2 * HIDDEN, 1), jnp.float32),
        # WN res_skip_layers: Conv1d 1x1; last layer only uses first HIDDEN rows
        "rs_w": 0.1 * jax.random.normal(ks[6], (N_LAYERS, 2 * HIDDEN, HIDDEN), jnp.float32),
        "rs_b": 0.1 * jax.random.normal(ks[7], (N_LAYERS, 2 * HIDDEN, 1), jnp.float32),
        # post Conv1d(hidden -> half, k=1): zero-initialized (per module __init__)
        "post_w": jnp.zeros((HALF, HIDDEN), jnp.float32),
        "post_b": jnp.zeros((HALF, 1), jnp.float32),
    }


if __name__ == "__main__":
    key = jax.random.PRNGKey(0)
    k_x, k_g, k_p = jax.random.split(key, 3)

    x = jax.random.normal(k_x, (B, CHANNELS, T), jnp.float32)
    lengths = jnp.array([T, 3 * T // 4], jnp.int32)
    x_mask = (lax.broadcasted_iota(jnp.int32, (B, 1, T), 2)
              < lengths[:, None, None]).astype(jnp.float32)
    style_embed = jax.random.normal(k_g, (B, GIN, T), jnp.float32)

    params = make_params(k_p)
    kparams = jax.tree_util.tree_map(jax.block_until_ready,
                                     prepare_params(params))

    fwd = jax.jit(residual_coupling_forward)
    x_out, logdet = fwd(x, x_mask, style_embed, kparams)
    jax.block_until_ready((x_out, logdet))

    x_ref, logdet_ref = ref_forward(x, x_mask, style_embed, params)
    assert x_out.shape == (B, CHANNELS, T) and logdet.shape == (B,)
    assert jnp.allclose(x_out, x_ref, atol=2e-3, rtol=2e-3)
    assert jnp.allclose(logdet, logdet_ref, atol=1e-6)

    print("KERNEL_OK")
</pallas_src>

<mosaic_0001>
module attributes {stable_mosaic.version = 11 : i64} {
  func.func @coupling_kernel(%arg0: i32, %arg1: memref<1x8x128xf32, #tpu.memory_space<vmem>>, %arg2: memref<1x1x128xf32, #tpu.memory_space<vmem>>, %arg3: memref<1x16x128xf32, #tpu.memory_space<vmem>>, %arg4: memref<224x20xf32, #tpu.memory_space<vmem>>, %arg5: memref<224x1xf32, #tpu.memory_space<vmem>>, %arg6: memref<3x64x160xf32, #tpu.memory_space<vmem>>, %arg7: memref<3x64x32xf32, #tpu.memory_space<vmem>>, %arg8: memref<3x64x1xf32, #tpu.memory_space<vmem>>, %arg9: memref<4x32xf32, #tpu.memory_space<vmem>>, %arg10: memref<4x1xf32, #tpu.memory_space<vmem>>, %arg11: memref<1x8x128xf32, #tpu.memory_space<vmem>>, %arg12: memref<160x128xf32, #tpu.memory_space<vmem>>) attributes {dimension_semantics = [#tpu.dimension_semantics<parallel>], iteration_bounds = array<i64: 2>, scalar_prefetch = 0 : i64, scratch_operands = 1 : i64, tpu.core_type = #tpu.core_type<tc>, window_params = [{transform_indices = @transform_0, window_bounds = array<i64: 1, 8, 128>}, {transform_indices = @transform_1, window_bounds = array<i64: 1, 1, 128>}, {transform_indices = @transform_2, window_bounds = array<i64: 1, 16, 128>}, {pipeline_mode = #tpu.pipeline_mode<synchronous>, transform_indices = @transform_3, window_bounds = array<i64: 224, 20>}, {pipeline_mode = #tpu.pipeline_mode<synchronous>, transform_indices = @transform_4, window_bounds = array<i64: 224, 1>}, {pipeline_mode = #tpu.pipeline_mode<synchronous>, transform_indices = @transform_5, window_bounds = array<i64: 3, 64, 160>}, {pipeline_mode = #tpu.pipeline_mode<synchronous>, transform_indices = @transform_6, window_bounds = array<i64: 3, 64, 32>}, {pipeline_mode = #tpu.pipeline_mode<synchronous>, transform_indices = @transform_7, window_bounds = array<i64: 3, 64, 1>}, {pipeline_mode = #tpu.pipeline_mode<synchronous>, transform_indices = @transform_8, window_bounds = array<i64: 4, 32>}, {pipeline_mode = #tpu.pipeline_mode<synchronous>, transform_indices = @transform_9, window_bounds = array<i64: 4, 1>}, {transform_indices = @transform_10, window_bounds = array<i64: 1, 8, 128>}]} {
    %c0 = arith.constant 0 : index
    %c0_0 = arith.constant 0 : index
    %c0_1 = arith.constant 0 : index
    %0 = vector.load %arg2[%c0, %c0_0, %c0_1] : memref<1x1x128xf32, #tpu.memory_space<vmem>>, vector<1x1x128xf32>
    %1 = vector.shape_cast %0 : vector<1x1x128xf32> to vector<1x128xf32>
    %c0_2 = arith.constant 0 : index
    %c0_3 = arith.constant 0 : index
    %c0_4 = arith.constant 0 : index
    %2 = vector.load %arg1[%c0_2, %c0_3, %c0_4] : memref<1x8x128xf32, #tpu.memory_space<vmem>>, vector<1x4x128xf32>
    %3 = vector.shape_cast %2 : vector<1x4x128xf32> to vector<4x128xf32>
    %c0_5 = arith.constant 0 : index
    %c4 = arith.constant 4 : index
    %c0_6 = arith.constant 0 : index
    %4 = vector.load %arg1[%c0_5, %c4, %c0_6] : memref<1x8x128xf32, #tpu.memory_space<vmem>>, vector<1x4x128xf32>
    %5 = vector.shape_cast %4 : vector<1x4x128xf32> to vector<4x128xf32>
    %c0_7 = arith.constant 0 : index
    %c0_8 = arith.constant 0 : index
    %c0_9 = arith.constant 0 : index
    %6 = vector.load %arg3[%c0_7, %c0_8, %c0_9] : memref<1x16x128xf32, #tpu.memory_space<vmem>>, vector<1x16x128xf32>
    %7 = vector.shape_cast %6 : vector<1x16x128xf32> to vector<16x128xf32>
    %8 = tpu.iota {dimensions = array<i32: 1>} : vector<1x128xi32>
    %c2_i32 = arith.constant 2 : i32
    %9 = vector.broadcast %c2_i32 : i32 to vector<1x128xi32>
    %10 = arith.cmpi sge, %8, %9 : vector<1x128xi32>
    %c1_i32 = arith.constant 1 : i32
    %11 = vector.broadcast %c1_i32 : i32 to vector<1x128xi32>
    %12 = arith.cmpi sge, %8, %11 : vector<1x128xi32>
    %c127_i32 = arith.constant 127 : i32
    %13 = vector.broadcast %c127_i32 : i32 to vector<1x128xi32>
    %14 = arith.cmpi slt, %8, %13 : vector<1x128xi32>
    %c126_i32 = arith.constant 126 : i32
    %15 = vector.broadcast %c126_i32 : i32 to vector<1x128xi32>
    %16 = arith.cmpi slt, %8, %15 : vector<1x128xi32>
    %c4_i32 = arith.constant 4 : i32
    %17 = vector.broadcast %c4_i32 : i32 to vector<1x128xi32>
    %18 = arith.cmpi sge, %8, %17 : vector<1x128xi32>
    %c124_i32 = arith.constant 124 : i32
    %19 = vector.broadcast %c124_i32 : i32 to vector<1x128xi32>
    %20 = arith.cmpi slt, %8, %19 : vector<1x128xi32>
    %c8_i32 = arith.constant 8 : i32
    %21 = vector.broadcast %c8_i32 : i32 to vector<1x128xi32>
    %22 = arith.cmpi sge, %8, %21 : vector<1x128xi32>
    %c120_i32 = arith.constant 120 : i32
    %23 = vector.broadcast %c120_i32 : i32 to vector<1x128xi32>
    %24 = arith.cmpi slt, %8, %23 : vector<1x128xi32>
    %25 = tpu.concatenate %3, %7 in 0 : vector<4x128xf32>, vector<16x128xf32> -> vector<20x128xf32>
    %c0_10 = arith.constant 0 : index
    %c0_11 = arith.constant 0 : index
    %26 = vector.load %arg4[%c0_10, %c0_11] : memref<224x20xf32, #tpu.memory_space<vmem>>, vector<224x20xf32>
    %cst = arith.constant dense<0.000000e+00> : vector<224x128xf32>
    %27 = tpu.matmul %26, %25, %cst {dimension_numbers = #tpu.dot_dimension_numbers<[1], [0], [0], [1], [0, 0, 1, 1], [], []>} : vector<224x20xf32>, vector<20x128xf32>, vector<224x128xf32> -> vector<224x128xf32>
    %c0_12 = arith.constant 0 : index
    %c0_13 = arith.constant 0 : index
    %28 = vector.load %arg5[%c0_12, %c0_13] : memref<224x1xf32, #tpu.memory_space<vmem>>, vector<224x1xf32>
    %29 = vector.broadcast %28 : vector<224x1xf32> to vector<224x128xf32>
    %30 = arith.addf %27, %29 : vector<224x128xf32>
    %31 = vector.extract_strided_slice %30 {offsets = [0, 0], sizes = [32, 128], strides = [1, 1]} : vector<224x128xf32> to vector<32x128xf32>
    %32 = vector.broadcast %1 : vector<1x128xf32> to vector<32x128xf32>
    %33 = arith.mulf %31, %32 : vector<32x128xf32>
    %34 = vector.extract_strided_slice %30 {offsets = [32, 0], sizes = [192, 128], strides = [1, 1]} : vector<224x128xf32> to vector<192x128xf32>
    %cst_14 = arith.constant 0.000000e+00 : f32
    %35 = vector.broadcast %cst_14 : f32 to vector<32x128xf32>
    %c2_i32_15 = arith.constant 2 : i32
    %36 = tpu.dynamic_rotate %33 by %c2_i32_15 dim 1 : vector<32x128xf32>, i32 -> vector<32x128xf32>
    %cst_16 = arith.constant 0.000000e+00 : f32
    %37 = vector.shape_cast %10 : vector<1x128xi1> to vector<1x128xi1>
    %38 = vector.broadcast %37 : vector<1x128xi1> to vector<32x128xi1>
    %39 = vector.broadcast %cst_16 : f32 to vector<32x128xf32>
    %40 = arith.select %38, %36, %39 : vector<32x128xi1>, vector<32x128xf32>
    %c0_17 = arith.constant 0 : index
    %c0_18 = arith.constant 0 : index
    %41 = vector.load %arg12[%c0_17, %c0_18] : memref<160x128xf32, #tpu.memory_space<vmem>>, vector<32x128xf32>
    tpu.vector_store %arg12[%c0_17, %c0_18], %40 {strides = array<i32>} : memref<160x128xf32, #tpu.memory_space<vmem>>, vector<32x128xf32>,
    %c1_i32_19 = arith.constant 1 : i32
    %42 = tpu.dynamic_rotate %33 by %c1_i32_19 dim 1 : vector<32x128xf32>, i32 -> vector<32x128xf32>
    %cst_20 = arith.constant 0.000000e+00 : f32
    %43 = vector.shape_cast %12 : vector<1x128xi1> to vector<1x128xi1>
    %44 = vector.broadcast %43 : vector<1x128xi1> to vector<32x128xi1>
    %45 = vector.broadcast %cst_20 : f32 to vector<32x128xf32>
    %46 = arith.select %44, %42, %45 : vector<32x128xi1>, vector<32x128xf32>
    %c32 = arith.constant 32 : index
    %c0_21 = arith.constant 0 : index
    %47 = vector.load %arg12[%c32, %c0_21] : memref<160x128xf32, #tpu.memory_space<vmem>>, vector<32x128xf32>
    tpu.vector_store %arg12[%c32, %c0_21], %46 {strides = array<i32>} : memref<160x128xf32, #tpu.memory_space<vmem>>, vector<32x128xf32>,
    %c64 = arith.constant 64 : index
    %c0_22 = arith.constant 0 : index
    %48 = vector.load %arg12[%c64, %c0_22] : memref<160x128xf32, #tpu.memory_space<vmem>>, vector<32x128xf32>
    tpu.vector_store %arg12[%c64, %c0_22], %33 {strides = array<i32>} : memref<160x128xf32, #tpu.memory_space<vmem>>, vector<32x128xf32>,
    %c127_i32_23 = arith.constant 127 : i32
    %49 = tpu.dynamic_rotate %33 by %c127_i32_23 dim 1 : vector<32x128xf32>, i32 -> vector<32x128xf32>
    %cst_24 = arith.constant 0.000000e+00 : f32
    %50 = vector.shape_cast %14 : vector<1x128xi1> to vector<1x128xi1>
    %51 = vector.broadcast %50 : vector<1x128xi1> to vector<32x128xi1>
    %52 = vector.broadcast %cst_24 : f32 to vector<32x128xf32>
    %53 = arith.select %51, %49, %52 : vector<32x128xi1>, vector<32x128xf32>
    %c96 = arith.constant 96 : index
    %c0_25 = arith.constant 0 : index
    %54 = vector.load %arg12[%c96, %c0_25] : memref<160x128xf32, #tpu.memory_space<vmem>>, vector<32x128xf32>
    tpu.vector_store %arg12[%c96, %c0_25], %53 {strides = array<i32>} : memref<160x128xf32, #tpu.memory_space<vmem>>, vector<32x128xf32>,
    %c126_i32_26 = arith.constant 126 : i32
    %55 = tpu.dynamic_rotate %33 by %c126_i32_26 dim 1 : vector<32x128xf32>, i32 -> vector<32x128xf32>
    %cst_27 = arith.constant 0.000000e+00 : f32
    %56 = vector.shape_cast %16 : vector<1x128xi1> to vector<1x128xi1>
    %57 = vector.broadcast %56 : vector<1x128xi1> to vector<32x128xi1>
    %58 = vector.broadcast %cst_27 : f32 to vector<32x128xf32>
    %59 = arith.select %57, %55, %58 : vector<32x128xi1>, vector<32x128xf32>
    %c128 = arith.constant 128 : index
    %c0_28 = arith.constant 0 : index
    %60 = vector.load %arg12[%c128, %c0_28] : memref<160x128xf32, #tpu.memory_space<vmem>>, vector<32x128xf32>
    tpu.vector_store %arg12[%c128, %c0_28], %59 {strides = array<i32>} : memref<160x128xf32, #tpu.memory_space<vmem>>, vector<32x128xf32>,
    %c0_29 = arith.constant 0 : index
    %c0_30 = arith.constant 0 : index
    %c0_31 = arith.constant 0 : index
    %61 = vector.load %arg6[%c0_29, %c0_30, %c0_31] : memref<3x64x160xf32, #tpu.memory_space<vmem>>, vector<1x64x160xf32>
    %62 = vector.shape_cast %61 : vector<1x64x160xf32> to vector<64x160xf32>
    %c0_32 = arith.constant 0 : index
    %c0_33 = arith.constant 0 : index
    %63 = vector.load %arg12[%c0_32, %c0_33] : memref<160x128xf32, #tpu.memory_space<vmem>>, vector<160x128xf32>
    %cst_34 = arith.constant dense<0.000000e+00> : vector<64x128xf32>
    %64 = tpu.matmul %62, %63, %cst_34 {dimension_numbers = #tpu.dot_dimension_numbers<[1], [0], [0], [1], [0, 0, 1, 1], [], []>} : vector<64x160xf32>, vector<160x128xf32>, vector<64x128xf32> -> vector<64x128xf32>
    %65 = vector.extract_strided_slice %34 {offsets = [0, 0], sizes = [64, 128], strides = [1, 1]} : vector<192x128xf32> to vector<64x128xf32>
    %66 = arith.addf %64, %65 : vector<64x128xf32>
    %67 = vector.extract_strided_slice %66 {offsets = [0, 0], sizes = [32, 128], strides = [1, 1]} : vector<64x128xf32> to vector<32x128xf32>
    %68 = math.tanh %67 : vector<32x128xf32>
    %69 = vector.extract_strided_slice %66 {offsets = [32, 0], sizes = [32, 128], strides = [1, 1]} : vector<64x128xf32> to vector<32x128xf32>
    %70 = arith.negf %69 : vector<32x128xf32>
    %71 = math.exp %70 : vector<32x128xf32>
    %cst_35 = arith.constant 1.000000e+00 : f32
    %72 = vector.broadcast %cst_35 : f32 to vector<32x128xf32>
    %73 = arith.addf %72, %71 : vector<32x128xf32>
    %74 = arith.divf %72, %73 : vector<32x128xf32>
    %75 = arith.mulf %68, %74 : vector<32x128xf32>
    %c0_36 = arith.constant 0 : index
    %c0_37 = arith.constant 0 : index
    %c0_38 = arith.constant 0 : index
    %76 = vector.load %arg7[%c0_36, %c0_37, %c0_38] : memref<3x64x32xf32, #tpu.memory_space<vmem>>, vector<1x64x32xf32>
    %77 = vector.shape_cast %76 : vector<1x64x32xf32> to vector<64x32xf32>
    %cst_39 = arith.constant dense<0.000000e+00> : vector<64x128xf32>
    %78 = tpu.matmul %77, %75, %cst_39 {dimension_numbers = #tpu.dot_dimension_numbers<[1], [0], [0], [1], [0, 0, 1, 1], [], []>} : vector<64x32xf32>, vector<32x128xf32>, vector<64x128xf32> -> vector<64x128xf32>
    %c0_40 = arith.constant 0 : index
    %c0_41 = arith.constant 0 : index
    %c0_42 = arith.constant 0 : index
    %79 = vector.load %arg8[%c0_40, %c0_41, %c0_42] : memref<3x64x1xf32, #tpu.memory_space<vmem>>, vector<1x64x1xf32>
    %80 = vector.shape_cast %79 : vector<1x64x1xf32> to vector<64x1xf32>
    %81 = vector.broadcast %80 : vector<64x1xf32> to vector<64x128xf32>
    %82 = arith.addf %78, %81 : vector<64x128xf32>
    %83 = vector.extract_strided_slice %82 {offsets = [0, 0], sizes = [32, 128], strides = [1, 1]} : vector<64x128xf32> to vector<32x128xf32>
    %84 = arith.addf %33, %83 : vector<32x128xf32>
    %85 = vector.broadcast %1 : vector<1x128xf32> to vector<32x128xf32>
    %86 = arith.mulf %84, %85 : vector<32x128xf32>
    %87 = vector.extract_strided_slice %82 {offsets = [32, 0], sizes = [32, 128], strides = [1, 1]} : vector<64x128xf32> to vector<32x128xf32>
    %88 = arith.addf %35, %87 : vector<32x128xf32>
    %c4_i32_43 = arith.constant 4 : i32
    %89 = tpu.dynamic_rotate %86 by %c4_i32_43 dim 1 : vector<32x128xf32>, i32 -> vector<32x128xf32>
    %cst_44 = arith.constant 0.000000e+00 : f32
    %90 = vector.shape_cast %18 : vector<1x128xi1> to vector<1x128xi1>
    %91 = vector.broadcast %90 : vector<1x128xi1> to vector<32x128xi1>
    %92 = vector.broadcast %cst_44 : f32 to vector<32x128xf32>
    %93 = arith.select %91, %89, %92 : vector<32x128xi1>, vector<32x128xf32>
    %c0_45 = arith.constant 0 : index
    %c0_46 = arith.constant 0 : index
    %94 = vector.load %arg12[%c0_45, %c0_46] : memref<160x128xf32, #tpu.memory_space<vmem>>, vector<32x128xf32>
    tpu.vector_store %arg12[%c0_45, %c0_46], %93 {strides = array<i32>} : memref<160x128xf32, #tpu.memory_space<vmem>>, vector<32x128xf32>,
    %c2_i32_47 = arith.constant 2 : i32
    %95 = tpu.dynamic_rotate %86 by %c2_i32_47 dim 1 : vector<32x128xf32>, i32 -> vector<32x128xf32>
    %cst_48 = arith.constant 0.000000e+00 : f32
    %96 = vector.shape_cast %10 : vector<1x128xi1> to vector<1x128xi1>
    %97 = vector.broadcast %96 : vector<1x128xi1> to vector<32x128xi1>
    %98 = vector.broadcast %cst_48 : f32 to vector<32x128xf32>
    %99 = arith.select %97, %95, %98 : vector<32x128xi1>, vector<32x128xf32>
    %c32_49 = arith.constant 32 : index
    %c0_50 = arith.constant 0 : index
    %100 = vector.load %arg12[%c32_49, %c0_50] : memref<160x128xf32, #tpu.memory_space<vmem>>, vector<32x128xf32>
    tpu.vector_store %arg12[%c32_49, %c0_50], %99 {strides = array<i32>} : memref<160x128xf32, #tpu.memory_space<vmem>>, vector<32x128xf32>,
    %c64_51 = arith.constant 64 : index
    %c0_52 = arith.constant 0 : index
    %101 = vector.load %arg12[%c64_51, %c0_52] : memref<160x128xf32, #tpu.memory_space<vmem>>, vector<32x128xf32>
    tpu.vector_store %arg12[%c64_51, %c0_52], %86 {strides = array<i32>} : memref<160x128xf32, #tpu.memory_space<vmem>>, vector<32x128xf32>,
    %c126_i32_53 = arith.constant 126 : i32
    %102 = tpu.dynamic_rotate %86 by %c126_i32_53 dim 1 : vector<32x128xf32>, i32 -> vector<32x128xf32>
    %cst_54 = arith.constant 0.000000e+00 : f32
    %103 = vector.shape_cast %16 : vector<1x128xi1> to vector<1x128xi1>
    %104 = vector.broadcast %103 : vector<1x128xi1> to vector<32x128xi1>
    %105 = vector.broadcast %cst_54 : f32 to vector<32x128xf32>
    %106 = arith.select %104, %102, %105 : vector<32x128xi1>, vector<32x128xf32>
    %c96_55 = arith.constant 96 : index
    %c0_56 = arith.constant 0 : index
    %107 = vector.load %arg12[%c96_55, %c0_56] : memref<160x128xf32, #tpu.memory_space<vmem>>, vector<32x128xf32>
    tpu.vector_store %arg12[%c96_55, %c0_56], %106 {strides = array<i32>} : memref<160x128xf32, #tpu.memory_space<vmem>>, vector<32x128xf32>,
    %c124_i32_57 = arith.constant 124 : i32
    %108 = tpu.dynamic_rotate %86 by %c124_i32_57 dim 1 : vector<32x128xf32>, i32 -> vector<32x128xf32>
    %cst_58 = arith.constant 0.000000e+00 : f32
    %109 = vector.shape_cast %20 : vector<1x128xi1> to vector<1x128xi1>
    %110 = vector.broadcast %109 : vector<1x128xi1> to vector<32x128xi1>
    %111 = vector.broadcast %cst_58 : f32 to vector<32x128xf32>
    %112 = arith.select %110, %108, %111 : vector<32x128xi1>, vector<32x128xf32>
    %c128_59 = arith.constant 128 : index
    %c0_60 = arith.constant 0 : index
    %113 = vector.load %arg12[%c128_59, %c0_60] : memref<160x128xf32, #tpu.memory_space<vmem>>, vector<32x128xf32>
    tpu.vector_store %arg12[%c128_59, %c0_60], %112 {strides = array<i32>} : memref<160x128xf32, #tpu.memory_space<vmem>>, vector<32x128xf32>,
    %c1 = arith.constant 1 : index
    %c0_61 = arith.constant 0 : index
    %c0_62 = arith.constant 0 : index
    %114 = vector.load %arg6[%c1, %c0_61, %c0_62] : memref<3x64x160xf32, #tpu.memory_space<vmem>>, vector<1x64x160xf32>
    %115 = vector.shape_cast %114 : vector<1x64x160xf32> to vector<64x160xf32>
    %c0_63 = arith.constant 0 : index
    %c0_64 = arith.constant 0 : index
    %116 = vector.load %arg12[%c0_63, %c0_64] : memref<160x128xf32, #tpu.memory_space<vmem>>, vector<160x128xf32>
    %cst_65 = arith.constant dense<0.000000e+00> : vector<64x128xf32>
    %117 = tpu.matmul %115, %116, %cst_65 {dimension_numbers = #tpu.dot_dimension_numbers<[1], [0], [0], [1], [0, 0, 1, 1], [], []>} : vector<64x160xf32>, vector<160x128xf32>, vector<64x128xf32> -> vector<64x128xf32>
    %118 = vector.extract_strided_slice %34 {offsets = [64, 0], sizes = [64, 128], strides = [1, 1]} : vector<192x128xf32> to vector<64x128xf32>
    %119 = arith.addf %117, %118 : vector<64x128xf32>
    %120 = vector.extract_strided_slice %119 {offsets = [0, 0], sizes = [32, 128], strides = [1, 1]} : vector<64x128xf32> to vector<32x128xf32>
    %121 = math.tanh %120 : vector<32x128xf32>
    %122 = vector.extract_strided_slice %119 {offsets = [32, 0], sizes = [32, 128], strides = [1, 1]} : vector<64x128xf32> to vector<32x128xf32>
    %123 = arith.negf %122 : vector<32x128xf32>
    %124 = math.exp %123 : vector<32x128xf32>
    %cst_66 = arith.constant 1.000000e+00 : f32
    %125 = vector.broadcast %cst_66 : f32 to vector<32x128xf32>
    %126 = arith.addf %125, %124 : vector<32x128xf32>
    %127 = arith.divf %125, %126 : vector<32x128xf32>
    %128 = arith.mulf %121, %127 : vector<32x128xf32>
    %c1_67 = arith.constant 1 : index
    %c0_68 = arith.constant 0 : index
    %c0_69 = arith.constant 0 : index
    %129 = vector.load %arg7[%c1_67, %c0_68, %c0_69] : memref<3x64x32xf32, #tpu.memory_space<vmem>>, vector<1x64x32xf32>
    %130 = vector.shape_cast %129 : vector<1x64x32xf32> to vector<64x32xf32>
    %cst_70 = arith.constant dense<0.000000e+00> : vector<64x128xf32>
    %131 = tpu.matmul %130, %128, %cst_70 {dimension_numbers = #tpu.dot_dimension_numbers<[1], [0], [0], [1], [0, 0, 1, 1], [], []>} : vector<64x32xf32>, vector<32x128xf32>, vector<64x128xf32> -> vector<64x128xf32>
    %c1_71 = arith.constant 1 : index
    %c0_72 = arith.constant 0 : index
    %c0_73 = arith.constant 0 : index
    %132 = vector.load %arg8[%c1_71, %c0_72, %c0_73] : memref<3x64x1xf32, #tpu.memory_space<vmem>>, vector<1x64x1xf32>
    %133 = vector.shape_cast %132 : vector<1x64x1xf32> to vector<64x1xf32>
    %134 = vector.broadcast %133 : vector<64x1xf32> to vector<64x128xf32>
    %135 = arith.addf %131, %134 : vector<64x128xf32>
    %136 = vector.extract_strided_slice %135 {offsets = [0, 0], sizes = [32, 128], strides = [1, 1]} : vector<64x128xf32> to vector<32x128xf32>
    %137 = arith.addf %86, %136 : vector<32x128xf32>
    %138 = vector.broadcast %1 : vector<1x128xf32> to vector<32x128xf32>
    %139 = arith.mulf %137, %138 : vector<32x128xf32>
    %140 = vector.extract_strided_slice %135 {offsets = [32, 0], sizes = [32, 128], strides = [1, 1]} : vector<64x128xf32> to vector<32x128xf32>
    %141 = arith.addf %88, %140 : vector<32x128xf32>
    %c8_i32_74 = arith.constant 8 : i32
    %142 = tpu.dynamic_rotate %139 by %c8_i32_74 dim 1 : vector<32x128xf32>, i32 -> vector<32x128xf32>
    %cst_75 = arith.constant 0.000000e+00 : f32
    %143 = vector.shape_cast %22 : vector<1x128xi1> to vector<1x128xi1>
    %144 = vector.broadcast %143 : vector<1x128xi1> to vector<32x128xi1>
    %145 = vector.broadcast %cst_75 : f32 to vector<32x128xf32>
    %146 = arith.select %144, %142, %145 : vector<32x128xi1>, vector<32x128xf32>
    %c0_76 = arith.constant 0 : index
    %c0_77 = arith.constant 0 : index
    %147 = vector.load %arg12[%c0_76, %c0_77] : memref<160x128xf32, #tpu.memory_space<vmem>>, vector<32x128xf32>
    tpu.vector_store %arg12[%c0_76, %c0_77], %146 {strides = array<i32>} : memref<160x128xf32, #tpu.memory_space<vmem>>, vector<32x128xf32>,
    %c4_i32_78 = arith.constant 4 : i32
    %148 = tpu.dynamic_rotate %139 by %c4_i32_78 dim 1 : vector<32x128xf32>, i32 -> vector<32x128xf32>
    %cst_79 = arith.constant 0.000000e+00 : f32
    %149 = vector.shape_cast %18 : vector<1x128xi1> to vector<1x128xi1>
    %150 = vector.broadcast %149 : vector<1x128xi1> to vector<32x128xi1>
    %151 = vector.broadcast %cst_79 : f32 to vector<32x128xf32>
    %152 = arith.select %150, %148, %151 : vector<32x128xi1>, vector<32x128xf32>
    %c32_80 = arith.constant 32 : index
    %c0_81 = arith.constant 0 : index
    %153 = vector.load %arg12[%c32_80, %c0_81] : memref<160x128xf32, #tpu.memory_space<vmem>>, vector<32x128xf32>
    tpu.vector_store %arg12[%c32_80, %c0_81], %152 {strides = array<i32>} : memref<160x128xf32, #tpu.memory_space<vmem>>, vector<32x128xf32>,
    %c64_82 = arith.constant 64 : index
    %c0_83 = arith.constant 0 : index
    %154 = vector.load %arg12[%c64_82, %c0_83] : memref<160x128xf32, #tpu.memory_space<vmem>>, vector<32x128xf32>
    tpu.vector_store %arg12[%c64_82, %c0_83], %139 {strides = array<i32>} : memref<160x128xf32, #tpu.memory_space<vmem>>, vector<32x128xf32>,
    %c124_i32_84 = arith.constant 124 : i32
    %155 = tpu.dynamic_rotate %139 by %c124_i32_84 dim 1 : vector<32x128xf32>, i32 -> vector<32x128xf32>
    %cst_85 = arith.constant 0.000000e+00 : f32
    %156 = vector.shape_cast %20 : vector<1x128xi1> to vector<1x128xi1>
    %157 = vector.broadcast %156 : vector<1x128xi1> to vector<32x128xi1>
    %158 = vector.broadcast %cst_85 : f32 to vector<32x128xf32>
    %159 = arith.select %157, %155, %158 : vector<32x128xi1>, vector<32x128xf32>
    %c96_86 = arith.constant 96 : index
    %c0_87 = arith.constant 0 : index
    %160 = vector.load %arg12[%c96_86, %c0_87] : memref<160x128xf32, #tpu.memory_space<vmem>>, vector<32x128xf32>
    tpu.vector_store %arg12[%c96_86, %c0_87], %159 {strides = array<i32>} : memref<160x128xf32, #tpu.memory_space<vmem>>, vector<32x128xf32>,
    %c120_i32_88 = arith.constant 120 : i32
    %161 = tpu.dynamic_rotate %139 by %c120_i32_88 dim 1 : vector<32x128xf32>, i32 -> vector<32x128xf32>
    %cst_89 = arith.constant 0.000000e+00 : f32
    %162 = vector.shape_cast %24 : vector<1x128xi1> to vector<1x128xi1>
    %163 = vector.broadcast %162 : vector<1x128xi1> to vector<32x128xi1>
    %164 = vector.broadcast %cst_89 : f32 to vector<32x128xf32>
    %165 = arith.select %163, %161, %164 : vector<32x128xi1>, vector<32x128xf32>
    %c128_90 = arith.constant 128 : index
    %c0_91 = arith.constant 0 : index
    %166 = vector.load %arg12[%c128_90, %c0_91] : memref<160x128xf32, #tpu.memory_space<vmem>>, vector<32x128xf32>
    tpu.vector_store %arg12[%c128_90, %c0_91], %165 {strides = array<i32>} : memref<160x128xf32, #tpu.memory_space<vmem>>, vector<32x128xf32>,
    %c2 = arith.constant 2 : index
    %c0_92 = arith.constant 0 : index
    %c0_93 = arith.constant 0 : index
    %167 = vector.load %arg6[%c2, %c0_92, %c0_93] : memref<3x64x160xf32, #tpu.memory_space<vmem>>, vector<1x64x160xf32>
    %168 = vector.shape_cast %167 : vector<1x64x160xf32> to vector<64x160xf32>
    %c0_94 = arith.constant 0 : index
    %c0_95 = arith.constant 0 : index
    %169 = vector.load %arg12[%c0_94, %c0_95] : memref<160x128xf32, #tpu.memory_space<vmem>>, vector<160x128xf32>
    %cst_96 = arith.constant dense<0.000000e+00> : vector<64x128xf32>
    %170 = tpu.matmul %168, %169, %cst_96 {dimension_numbers = #tpu.dot_dimension_numbers<[1], [0], [0], [1], [0, 0, 1, 1], [], []>} : vector<64x160xf32>, vector<160x128xf32>, vector<64x128xf32> -> vector<64x128xf32>
    %171 = vector.extract_strided_slice %34 {offsets = [128, 0], sizes = [64, 128], strides = [1, 1]} : vector<192x128xf32> to vector<64x128xf32>
    %172 = arith.addf %170, %171 : vector<64x128xf32>
    %173 = vector.extract_strided_slice %172 {offsets = [0, 0], sizes = [32, 128], strides = [1, 1]} : vector<64x128xf32> to vector<32x128xf32>
    %174 = math.tanh %173 : vector<32x128xf32>
    %175 = vector.extract_strided_slice %172 {offsets = [32, 0], sizes = [32, 128], strides = [1, 1]} : vector<64x128xf32> to vector<32x128xf32>
    %176 = arith.negf %175 : vector<32x128xf32>
    %177 = math.exp %176 : vector<32x128xf32>
    %cst_97 = arith.constant 1.000000e+00 : f32
    %178 = vector.broadcast %cst_97 : f32 to vector<32x128xf32>
    %179 = arith.addf %178, %177 : vector<32x128xf32>
    %180 = arith.divf %178, %179 : vector<32x128xf32>
    %181 = arith.mulf %174, %180 : vector<32x128xf32>
    %c2_98 = arith.constant 2 : index
    %c0_99 = arith.constant 0 : index
    %c0_100 = arith.constant 0 : index
    %182 = vector.load %arg7[%c2_98, %c0_99, %c0_100] : memref<3x64x32xf32, #tpu.memory_space<vmem>>, vector<1x64x32xf32>
    %183 = vector.shape_cast %182 : vector<1x64x32xf32> to vector<64x32xf32>
    %184 = vector.extract_strided_slice %183 {offsets = [0, 0], sizes = [32, 32], strides = [1, 1]} : vector<64x32xf32> to vector<32x32xf32>
    %cst_101 = arith.constant dense<0.000000e+00> : vector<32x128xf32>
    %185 = tpu.matmul %184, %181, %cst_101 {dimension_numbers = #tpu.dot_dimension_numbers<[1], [0], [0], [1], [0, 0, 1, 1], [], []>} : vector<32x32xf32>, vector<32x128xf32>, vector<32x128xf32> -> vector<32x128xf32>
    %c2_102 = arith.constant 2 : index
    %c0_103 = arith.constant 0 : index
    %c0_104 = arith.constant 0 : index
    %186 = vector.load %arg8[%c2_102, %c0_103, %c0_104] : memref<3x64x1xf32, #tpu.memory_space<vmem>>, vector<1x64x1xf32>
    %187 = vector.shape_cast %186 : vector<1x64x1xf32> to vector<64x1xf32>
    %188 = vector.extract_strided_slice %187 {offsets = [0, 0], sizes = [32, 1], strides = [1, 1]} : vector<64x1xf32> to vector<32x1xf32>
    %189 = vector.broadcast %188 : vector<32x1xf32> to vector<32x128xf32>
    %190 = arith.addf %185, %189 : vector<32x128xf32>
    %191 = arith.addf %141, %190 : vector<32x128xf32>
    %192 = vector.broadcast %1 : vector<1x128xf32> to vector<32x128xf32>
    %193 = arith.mulf %191, %192 : vector<32x128xf32>
    %c0_105 = arith.constant 0 : index
    %c0_106 = arith.constant 0 : index
    %194 = vector.load %arg9[%c0_105, %c0_106] : memref<4x32xf32, #tpu.memory_space<vmem>>, vector<4x32xf32>
    %cst_107 = arith.constant dense<0.000000e+00> : vector<4x128xf32>
    %195 = tpu.matmul %194, %193, %cst_107 {dimension_numbers = #tpu.dot_dimension_numbers<[1], [0], [0], [1], [0, 0, 1, 1], [], []>} : vector<4x32xf32>, vector<32x128xf32>, vector<4x128xf32> -> vector<4x128xf32>
    %c0_108 = arith.constant 0 : index
    %c0_109 = arith.constant 0 : index
    %196 = vector.load %arg10[%c0_108, %c0_109] : memref<4x1xf32, #tpu.memory_space<vmem>>, vector<4x1xf32>
    %197 = vector.broadcast %196 : vector<4x1xf32> to vector<4x128xf32>
    %198 = arith.addf %195, %197 : vector<4x128xf32>
    %199 = vector.broadcast %1 : vector<1x128xf32> to vector<4x128xf32>
    %200 = arith.mulf %198, %199 : vector<4x128xf32>
    %201 = vector.broadcast %1 : vector<1x128xf32> to vector<4x128xf32>
    %202 = arith.mulf %5, %201 : vector<4x128xf32>
    %203 = arith.addf %200, %202 : vector<4x128xf32>
    %204 = tpu.concatenate %3, %203 in 0 : vector<4x128xf32>, vector<4x128xf32> -> vector<8x128xf32>
    %c0_110 = arith.constant 0 : index
    %c0_111 = arith.constant 0 : index
    %c0_112 = arith.constant 0 : index
    %205 = vector.load %arg11[%c0_110, %c0_111, %c0_112] : memref<1x8x128xf32, #tpu.memory_space<vmem>>, vector<1x8x128xf32>
    %206 = vector.shape_cast %205 : vector<1x8x128xf32> to vector<8x128xf32>
    %207 = vector.shape_cast %204 : vector<8x128xf32> to vector<1x8x128xf32>
    tpu.vector_store %arg11[%c0_110, %c0_111, %c0_112], %207 {strides = array<i32>} : memref<1x8x128xf32, #tpu.memory_space<vmem>>, vector<1x8x128xf32>,
    return
  }
  func.func @transform_0(%arg0: i32) -> (i32, i32, i32) {
    %c0_i32 = arith.constant 0 : i32
    %c0_i32_0 = arith.constant 0 : i32
    %c0_i32_1 = arith.constant 0 : i32
    return %arg0, %c0_i32, %c0_i32_0 : i32, i32, i32
  }
  func.func @transform_1(%arg0: i32) -> (i32, i32, i32) {
    %c0_i32 = arith.constant 0 : i32
    %c0_i32_0 = arith.constant 0 : i32
    %c0_i32_1 = arith.constant 0 : i32
    return %arg0, %c0_i32, %c0_i32_0 : i32, i32, i32
  }
  func.func @transform_2(%arg0: i32) -> (i32, i32, i32) {
    %c0_i32 = arith.constant 0 : i32
    %c0_i32_0 = arith.constant 0 : i32
    %c0_i32_1 = arith.constant 0 : i32
    return %arg0, %c0_i32, %c0_i32_0 : i32, i32, i32
  }
  func.func @transform_3(%arg0: i32) -> (i32, i32) {
    %c0_i32 = arith.constant 0 : i32
    %c0_i32_0 = arith.constant 0 : i32
    %c0_i32_1 = arith.constant 0 : i32
    return %c0_i32, %c0_i32_0 : i32, i32
  }
  func.func @transform_4(%arg0: i32) -> (i32, i32) {
    %c0_i32 = arith.constant 0 : i32
    %c0_i32_0 = arith.constant 0 : i32
    %c0_i32_1 = arith.constant 0 : i32
    return %c0_i32, %c0_i32_0 : i32, i32
  }
  func.func @transform_5(%arg0: i32) -> (i32, i32, i32) {
    %c0_i32 = arith.constant 0 : i32
    %c0_i32_0 = arith.constant 0 : i32
    %c0_i32_1 = arith.constant 0 : i32
    %c0_i32_2 = arith.constant 0 : i32
    return %c0_i32, %c0_i32_0, %c0_i32_1 : i32, i32, i32
  }
  func.func @transform_6(%arg0: i32) -> (i32, i32, i32) {
    %c0_i32 = arith.constant 0 : i32
    %c0_i32_0 = arith.constant 0 : i32
    %c0_i32_1 = arith.constant 0 : i32
    %c0_i32_2 = arith.constant 0 : i32
    return %c0_i32, %c0_i32_0, %c0_i32_1 : i32, i32, i32
  }
  func.func @transform_7(%arg0: i32) -> (i32, i32, i32) {
    %c0_i32 = arith.constant 0 : i32
    %c0_i32_0 = arith.constant 0 : i32
    %c0_i32_1 = arith.constant 0 : i32
    %c0_i32_2 = arith.constant 0 : i32
    return %c0_i32, %c0_i32_0, %c0_i32_1 : i32, i32, i32
  }
  func.func @transform_8(%arg0: i32) -> (i32, i32) {
    %c0_i32 = arith.constant 0 : i32
    %c0_i32_0 = arith.constant 0 : i32
    %c0_i32_1 = arith.constant 0 : i32
    return %c0_i32, %c0_i32_0 : i32, i32
  }
  func.func @transform_9(%arg0: i32) -> (i32, i32) {
    %c0_i32 = arith.constant 0 : i32
    %c0_i32_0 = arith.constant 0 : i32
    %c0_i32_1 = arith.constant 0 : i32
    return %c0_i32, %c0_i32_0 : i32, i32
  }
  func.func @transform_10(%arg0: i32) -> (i32, i32, i32) {
    %c0_i32 = arith.constant 0 : i32
    %c0_i32_0 = arith.constant 0 : i32
    %c0_i32_1 = arith.constant 0 : i32
    return %arg0, %c0_i32, %c0_i32_0 : i32, i32, i32
  }
}

</mosaic_0001>

<bundles_post_ra>
// kernel: residual_coupling_forward.1
= control target key start
LH: loop header
LB: loop body
LE: loop exit
PB: predicated region body
PF: predicated region fallthrough
CT: control target
= control target key end

     0   :  { %15 = vsyncpa [#allocation4], 0  ;;  %s4274_s0 = inlined_call_operand.vmem [shape: f32[2,8,128], index: 0, kind: input, shape index: {}]   ;;  %s4275_s1 = inlined_call_operand.vmem [shape: f32[2,1,128], index: 1, kind: input, shape index: {}]   ;;  %s4276_s2 = inlined_call_operand.vmem [shape: f32[2,16,128], index: 2, kind: input, shape index: {}]   ;;  %s4277_s3 = inlined_call_operand.vmem [shape: f32[224,20], index: 3, kind: input, shape index: {}]   ;;  %s4278_s4 = inlined_call_operand.vmem [shape: f32[224,1], index: 4, kind: input, shape index: {}]   ;;  %s4279_s5 = inlined_call_operand.vmem [shape: f32[3,64,160], index: 5, kind: input, shape index: {}]   ;;  %s4280_s6 = inlined_call_operand.vmem [shape: f32[3,64,32], index: 6, kind: input, shape index: {}]   ;;  %s4281_s7 = inlined_call_operand.vmem [shape: f32[3,64,1], index: 7, kind: input, shape index: {}]   ;;  %s4282_s8 = inlined_call_operand.vmem [shape: f32[4,32], index: 8, kind: input, shape index: {}]   ;;  %s4283_s9 = inlined_call_operand.vmem [shape: f32[4,1], index: 9, kind: input, shape index: {}]   ;;  %s4284_s10 = inlined_call_operand.hbm [shape: f32[2,8,128], index: 10, kind: output, shape index: {}]  }
   0x1   :  { %17 = vsyncpa [#allocation4 + $0x1], 0  ;;  %s3374_s13 = smov 0   ;;  %s3376_s14 = smov 0  }
   0x2   :  { %s3378_s15 = smov 0   ;;  %s3380_s16 = smov 0  }
   0x3 LB: > { %4288 = sst [smem:[#allocation6_spill]] %s3300_s15  ;;  %s3395_s17 = sadd.s32 4294967295, %s3304_s16   ;;  %s3304_s16 = sphi %s3380_s16, %s4305_s16   ;;  %s3300_s15 = sphi %s3378_s15, %s4302_s15   ;;  %s3296_s14 = sphi %s3376_s14, %s4304_s14   ;;  %s3292_s13 = sphi %s3374_s13, %s4303_s13  }
   0x4   : > { %s2438_s18 = sadd.s32 4294967294, %s3304_s16   ;;  %s3399_s19 = sadd.s32 1, %s3304_s16  }
   0x5   : > { %s255_s20 = sadd.s32 1, %s3300_s15  ;;  %s252_s21 = ssub.s32 %s3304_s16, %s3399_s19 }
   0x6   : > { %p265_p0 = scmp.ne.s32.totalorder %s3300_s15, %s3296_s14  ;;  %p253_p1 = scmp.eq.s32.totalorder %s252_s21, 0 }
   0x7   : > { %p266_p2 = scmp.eq.s32.totalorder %s3395_s17, 1  ;;  %p271_p3 = scmp.ne.s32.totalorder %s3296_s14, %s3292_s13 }
   0x8   : > { %p272_p4 = scmp.eq.s32.totalorder %s2438_s18, 1  ;;  %p2441_p7 = scmp.ge.s32.totalorder %s3304_s16, 1 }
   0x9   : > { %s3410_s22 = scalar_select %p253_p1, %s3300_s15, %s255_s20  }
   0xa   : > { %p3412_p5 = por %p266_p2, %p265_p0  ;;  %p3416_p6 = por %p272_p4, %p271_p3 }
   0xb   : > { %4289 = sst [smem:[#allocation7_spill]] %s3410_s22  ;;  %p332_p8 = scmp.lt.s32.totalorder %s3304_s16, 3 }
   0xd   : > { %p333_p9 = pnand %p2441_p7, %p332_p8 }
   0xe   : > { %p377_p10 = scmp.lt.s32.totalorder (!%p333_p9), %s3395_s17, 1  ;;  %v413_v0 = vld [vmem:[%s4277_s3] sm:$0xff] (!%p333_p9)  ;;  %vm609_vm0 = vcmask (!%p333_p9), 162816   ;;  %v443_v2 = vld [vmem:[%s4278_s4 + $0x10] sm:$0xff] (!%p333_p9)  ;;  %v3306_v3 = vmov (!%p333_p9), 0   ;;  %v442_v5 = vld [vmem:[%s4278_s4 + $0x8] sm:$0xff] (!%p333_p9) }
   0xf   : > { %336 = sbr.rel (%p333_p9) target bundleno = 2463 (0x99f), region = 60  ;;  %2716 = vmatprep.mubr.msk.f32.mxu0 (!%p333_p9), %vm609_vm0, %v413_v0  ;;  %v441_v1 = vld [vmem:[%s4278_s4] sm:$0xff] (!%p333_p9)  ;;  %3046 = vset.pattern.permute.xlu0 (!%p333_p9), %v3306_v3  ;;  %v444_v6 = vld [vmem:[%s4278_s4 + $0x18] sm:$0xff] (!%p333_p9)  ;;  %vm406_vm1 = vcmask (!%p333_p9), 1043456   ;;  %v414_v15 = vld [vmem:[%s4277_s3 + $0x8] sm:$0xff] (!%p333_p9)  ;;  %v3307_v27 = vmov (!%p333_p9), 0.0|0.0  }
  0x10   : > { %3047 = vset.pattern.permute.xlu1 (!%p333_p9), %v3306_v3  ;;  %v421_v4 = vld [vmem:[%s4277_s3 + $0x40] sm:$0xff] (!%p333_p9)  ;;  %471 = vperm.xlu0 (!%p333_p9), %3046, %v441_v1   ;;  %v422_v16 = vld [vmem:[%s4277_s3 + $0x48] sm:$0xff] (!%p333_p9)  ;;  %v415_v17 = vld [vmem:[%s4277_s3 + $0x10] sm:$0xff] (!%p333_p9)  ;;  %s3308_s25 = smov (!%p333_p9), 2   ;;  %s3310_s29 = smov (!%p333_p9), 127   ;;  %vm1023_vm2 = vcmask (!%p333_p9), 261120  }
  0x11   : > { %481 = vperm.xlu1 (!%p333_p9), %3047, %v443_v2   ;;  %2728 = vmatprep.mubr.msk.f32.mxu1 (!%p333_p9), %vm609_vm0, %v421_v4  ;;  %v423_v18 = vld [vmem:[%s4277_s3 + $0x50] sm:$0xff] (!%p333_p9)  ;;  %v416_v19 = vld [vmem:[%s4277_s3 + $0x18] sm:$0xff] (!%p333_p9)  ;;  %v417_v21 = vld [vmem:[%s4277_s3 + $0x20] sm:$0xff] (!%p333_p9)  ;;  %s3311_s21 = smov (!%p333_p9), 126   ;;  %s4286_s18 = smov (!%p333_p9), 124  }
  0x12   : > { %v424_v20 = vld [vmem:[%s4277_s3 + $0x58] sm:$0xff] (!%p333_p9)  ;;  %v418_v22 = vld [vmem:[%s4277_s3 + $0x28] sm:$0xff] (!%p333_p9)  ;;  %v419_v23 = vld [vmem:[%s4277_s3 + $0x30] sm:$0xff] (!%p333_p9) }
  0x13   : > { %v420_v24 = vld [vmem:[%s4277_s3 + $0x38] sm:$0xff] (!%p333_p9)  ;;  %v425_v38 = vld [vmem:[%s4277_s3 + $0x60] sm:$0xff] (!%p333_p9)  ;;  %v426_v41 = vld [vmem:[%s4277_s3 + $0x68] sm:$0xff] (!%p333_p9) }
  0x14   : > { %476 = vperm.xlu0 (!%p333_p9), %3046, %v442_v5   ;;  %v427_v46 = vld [vmem:[%s4277_s3 + $0x70] sm:$0xff] (!%p333_p9)  ;;  %v428_v47 = vld [vmem:[%s4277_s3 + $0x78] sm:$0xff] (!%p333_p9)  ;;  %v429_v49 = vld [vmem:[%s4277_s3 + $0x80] sm:$0xff] (!%p333_p9) }
  0x15   : > { %486 = vperm.xlu1 (!%p333_p9), %3047, %v444_v6   ;;  %v430_v50 = vld [vmem:[%s4277_s3 + $0x88] sm:$0xff] (!%p333_p9)  ;;  %v431_v51 = vld [vmem:[%s4277_s3 + $0x90] sm:$0xff] (!%p333_p9)  ;;  %v432_v52 = vld [vmem:[%s4277_s3 + $0x98] sm:$0xff] (!%p333_p9) }
  0x16   : > { %s3434_s11 = scalar_select %p377_p10, %s3395_s17, 1  ;;  %v433_v53 = vld [vmem:[%s4277_s3 + $0xa0] sm:$0xff]  ;;  %v434_v54 = vld [vmem:[%s4277_s3 + $0xa8] sm:$0xff]  ;;  %v435_v58 = vld [vmem:[%s4277_s3 + $0xb0] sm:$0xff] }
  0x17   : > { %v449_v57 = vld [vmem:[%s4278_s4 + $0x40] sm:$0xff]  ;;  %v436_v59 = vld [vmem:[%s4277_s3 + $0xb8] sm:$0xff]  ;;  %v450_v61 = vld [vmem:[%s4278_s4 + $0x48] sm:$0xff] }
  0x18   : > { %s2443_s20 = sshll.u32 %s3434_s11, 3  ;;  %s2593_s12 = sshll.u32 %s3434_s11, 4  ;;  %v451_v62 = vld [vmem:[%s4278_s4 + $0x50] sm:$0xff]  ;;  %v437_v0 = vld [vmem:[%s4277_s3 + $0xc0] sm:$0xff]  ;;  %v438_v1 = vld [vmem:[%s4277_s3 + $0xc8] sm:$0xff] }
  0x19   : > { %s3450_s30 = scalar_lea.vmem %s4274_s0, %s2443_s20  ;;  %s388_s15 = scalar_lea.vmem %s4276_s2, %s2593_s12  ;;  %v452_v3 = vld [vmem:[%s4278_s4 + $0x58] sm:$0xff]  ;;  %v445_v4 = vld [vmem:[%s4278_s4 + $0x20] sm:$0xff]  ;;  %v439_v6 = vld [vmem:[%s4277_s3 + $0xd0] sm:$0xff] }
  0x1a   : > { %v390_v7 = vld [vmem:[%s3450_s30] sm:$0xf]  ;;  %v393_v9 = vld [vmem:[%s388_s15 + $0x8] sm:$0xff]  ;;  %s3507_s22 = scalar_lea.vmem %s4275_s1, %s3434_s11  ;;  %s3309_s12 = smov 1  }
  0x1b   : > { %v392_v8 = vld [vmem:[%s388_s15] sm:$0xff]  ;;  %v408_v11 = vrot.slane %v393_v9, 4  ;;  %v446_v9 = vld [vmem:[%s4278_s4 + $0x28] sm:$0xff]  ;;  %s4300_s20 = smov 124   ;;  %s374_s15 = sand.u32 1, %s3296_s14  }
  0x1c   : > { %v407_v10 = vrot.slane %v392_v8, 4  ;;  %v3511_v28 = vld [vmem:[%s3507_s22] ss:$0 sm:$0xff]  ;;  %s2345_s28 = scalar_lea.sflag [#allocation4], %s374_s15 }
  0x1e   : > { %v409_v12 = vsel %vm406_vm1, %v407_v10, %v408_v11  ;;  %v412_v13 = vsel %vm406_vm1, %v390_v7, %v407_v10  ;;  %v440_v7 = vld [vmem:[%s4277_s3 + $0xd8] sm:$0xff]  ;;  %v447_v10 = vld [vmem:[%s4278_s4 + $0x30] sm:$0xff] }
  0x1f   : > { %v2823_v14 = vpack.c.bf16 %v409_v12, %v412_v13  ;;  %v988_v12 = vld [vmem:[%s4279_s5 + $0x8] sm:$0xff]  ;;  %v448_v13 = vld [vmem:[%s4278_s4 + $0x38] sm:$0xff] }
  0x21   : > { %2824 = vmatprep.subr.bf16.mxu0 %v2823_v14  ;;  %2971 = vmatprep.subr.bf16.mxu1 %v2823_v14 }
  0x22   : > { %2826 = vmatpush3.bf16.msra.mxu0 %v2823_v14  ;;  %2973 = vmatpush3.bf16.msra.mxu1 %v2823_v14  ;;  %v1193_v14 = vld [vmem:[%s4281_s7] sm:$0xff] }
  0x23   : > { %2714 = vmatprep.subr.msk.mxu0 %vm406_vm1, %v408_v11  ;;  %2972 = vmatprep.subr.msk.mxu1 %vm406_vm1, %v408_v11 }
  0x26   : > { %2715 = vmatpush3.msk.msra.mxu0 %vm406_vm1, %v408_v11  ;;  %2974 = vmatpush3.msk.msra.mxu1 %vm406_vm1, %v408_v11 }
  0x27   : > { %2717 = vmatmul.mubr.msk.f32.vlgmr.msra.gmra.mrb[0].mxu0 %vm609_vm0, %v414_v15  ;;  %2729 = vmatmul.mubr.msk.f32.vlgmr.msra.gmra.mrb[0].mxu1 %vm609_vm0, %v422_v16  ;;  %v1194_v15 = vld [vmem:[%s4281_s7 + $0x8] sm:$0xff]  ;;  %v1195_v16 = vld [vmem:[%s4281_s7 + $0x10] sm:$0xff] }
  0x28   : > { %2719 = vmatprep.mubr.msk.f32.mxu0 %vm609_vm0, %v415_v17  ;;  %2731 = vmatprep.mubr.msk.f32.mxu1 %vm609_vm0, %v423_v18  ;;  %v1196_v17 = vld [vmem:[%s4281_s7 + $0x18] sm:$0xff]  ;;  %v394_v18 = vlaneseq }
  0x29   : > { %2827 = vmatprep.subr.bf16.mxu1 %v3307_v27 }
  0x2b   : > { %2720 = vmatmul.mubr.msk.f32.gmra.mrb[2].mxu0 %vm609_vm0, %v416_v19  ;;  %2732 = vmatmul.mubr.msk.f32.gmra.mrb[2].mxu1 %vm609_vm0, %v424_v20  ;;  %v3653_v19 = vand.u32 127, %v394_v18  ;;  %v999_v18 = vld [vmem:[%s4279_s5 + $0x60] sm:$0xff] }
  0x2c   : > { %2722 = vmatprep.mubr.msk.f32.mxu0 %vm609_vm0, %v417_v21  ;;  %2734 = vmatprep.mubr.msk.f32.mxu1 %vm609_vm0, %v425_v38 }
  0x2d   : > { %vm396_vm3 = vcmp.ge.s32.totalorder %v3653_v19, 2  ;;  %vm397_vm5 = vcmp.ge.s32.totalorder %v3653_v19, 1  ;;  %vm398_vm7 = vcmp.lt.s32.totalorder %v3653_v19, 127  ;;  %vm399_vm9 = vcmp.lt.s32.totalorder %v3653_v19, 126 }
  0x2e   : > { %vm3656_vm4 = vmpackc.low %vm396_vm3, %vm396_vm3  ;;  %vm400_vm11 = vcmp.ge.s32.totalorder %v3653_v19, 4  ;;  %vm401_vm13 = vcmp.lt.s32.totalorder %v3653_v19, 124  ;;  %vm402_vm15 = vcmp.ge.s32.totalorder %v3653_v19, 8  ;;  %vm403_vm3 = vcmp.lt.s32.totalorder %v3653_v19, 120  ;;  %v2551_v19 = vld [vmem:[%s4279_s5 + $0x118] sm:$0xff] }
  0x2f   : > { %2723 = vmatmul.mubr.msk.f32.gmra.mrb[4].mxu0 %vm609_vm0, %v418_v22  ;;  %2735 = vmatmul.mubr.msk.f32.gmra.mrb[4].mxu1 %vm609_vm0, %v426_v41  ;;  %vm2837_vm6 = vmpackc.low %vm397_vm5, %vm397_vm5  ;;  %vm3316_vm5 = vmmov 0  }
  0x30   : > { %2725 = vmatprep.mubr.msk.f32.mxu0 %vm609_vm0, %v419_v23  ;;  %2737 = vmatprep.mubr.msk.f32.mxu1 %vm609_vm0, %v427_v46  ;;  %vm2851_vm8 = vmpackc.low %vm398_vm7, %vm398_vm7 }
  0x31   : > { %vm3679_vm10 = vmpackc.low %vm399_vm9, %vm399_vm9 }
  0x32   : > { %vm3866_vm12 = vmpackc.low %vm400_vm11, %vm400_vm11 }
  0x33   : > { %2726 = vmatmul.mubr.msk.f32.gmra.mrb[6].mxu0 %vm609_vm0, %v420_v24  ;;  %2738 = vmatmul.mubr.msk.f32.gmra.mrb[6].mxu1 %vm609_vm0, %v428_v47  ;;  %vm3895_vm14 = vmpackc.low %vm401_vm13, %vm401_vm13 }
  0x34   : > { %2740 = vmatprep.mubr.msk.f32.mxu1 %vm609_vm0, %v429_v49 }
  0x37   : > { %2741 = vmatmul.mubr.msk.f32.gmra.mrb[8].mxu1 %vm609_vm0, %v430_v50 }
  0x38   : > { %2743 = vmatprep.mubr.msk.f32.mxu1 %vm609_vm0, %v431_v51 }
  0x3b   : > { %2744 = vmatmul.mubr.msk.f32.gmra.mrb[10].mxu1 %vm609_vm0, %v432_v52 }
  0x3c   : > { %2746 = vmatprep.mubr.msk.f32.mxu1 %vm609_vm0, %v433_v53 }
  0x3f   : > { %2747 = vmatmul.mubr.msk.f32.gmra.mrb[12].mxu1 %vm609_vm0, %v434_v54 }
  0x40   : > { %2749 = vmatprep.mubr.msk.f32.mxu1 %vm609_vm0, %v435_v58 }
  0x43   : > { %2750 = vmatmul.mubr.msk.f32.gmra.mrb[14].mxu1 %vm609_vm0, %v436_v59  ;;  %v2496_v59 = vld [vmem:[%s4279_s5 + $0x80] sm:$0xff] }
  0x44   : > { %2752 = vmatprep.mubr.msk.f32.mxu1 %vm609_vm0, %v437_v0 }
  0x47   : > { %2753 = vmatmul.mubr.msk.f32.gmra.mrb[16].mxu1 %vm609_vm0, %v438_v1 }
  0x48   : > { %2755 = vmatprep.mubr.msk.f32.mxu1 %vm609_vm0, %v439_v6  ;;  %v989_v6 = vld [vmem:[%s4279_s5 + $0x10] sm:$0xff] }
  0x4b   : > { %2756 = vmatmul.mubr.msk.f32.gmra.mrb[18].mxu1 %vm609_vm0, %v440_v7  ;;  %v992_v7 = vld [vmem:[%s4279_s5 + $0x28] sm:$0xff]  ;;  %vm2921_vm0 = vmpackc.low %vm402_vm15, %vm402_vm15 }
  0x4c   : > { %2476 = vmatprep.mubr.msk.f32.mxu1 %vm1023_vm2, %v988_v12  ;;  %v993_v12 = vld [vmem:[%s4279_s5 + $0x30] sm:$0xff] }
  0x8f   : > { %v472_v25 = vpop.permute.xlu0 %471 }
  0x90   : > { %v482_v26 = vpop.permute.xlu1 %481 }
  0x93   : > { %v477_v29 = vpop.permute.xlu0 %476 }
  0x94   : > { %v487_v35 = vpop.permute.xlu1 %486 }
  0xfa   : > { %v2718_v30 = vpop.f32.mrb[0].mxu0  ;;  %v3569_v55 = vpop.f32.mrb[0].mxu1 }
  0xfb   : > { %v768_v31 = vadd.f32 %v2718_v30, %v477_v29  ;;  %v762_v32 = vpop.f32.mrb[1].mxu0  ;;  %v3572_v56 = vpop.f32.mrb[1].mxu1 }
  0xfc   : > { %v763_v33 = vadd.f32 %v762_v32, %v472_v25 }
  0xfd   : > { %v3514_v34 = vmul.f32 %v3511_v28, %v768_v31 }
  0xfe   : > { %v3517_v36 = vmul.f32 %v3511_v28, %v763_v33  ;;  %v2721_v37 = vpop.f32.mrb[2].mxu0  ;;  %v3586_v60 = vpop.f32.mrb[2].mxu1 }
  0xff   : > { %v778_v39 = vadd.f32 %v2721_v37, %v487_v35  ;;  %v772_v40 = vpop.f32.mrb[3].mxu0  ;;  %v3595_v63 = vpop.f32.mrb[3].mxu1 }
 0x100   : > { %v773_v42 = vadd.f32 %v772_v40, %v482_v26  ;;  %v3048_v43 = vpack.i.bf16 %v3514_v34, %v3517_v36  ;;  %v2844_v41 = vpack.c.bf16 %v3514_v34, %v3517_v36 }
 0x101   : > { %v3530_v44 = vmul.f32 %v3511_v28, %v778_v39 }
 0x102   : > { %v3533_v45 = vmul.f32 %v3511_v28, %v773_v42  ;;  %3049 = vrot.lane.b32.xlu0 %v3048_v43, %s3308_s25  ;;  %v3604_v2 = vpop.f32.mrb[4].mxu0 }
 0x103   : > { %v3613_v5 = vpop.f32.mrb[5].mxu0 }
 0x104   : > { %v3053_v48 = vpack.i.bf16 %v3530_v44, %v3533_v45  ;;  %v2847_v47 = vpack.c.bf16 %v3530_v44, %v3533_v45 }
 0x106   : > { %3054 = vrot.lane.b32.xlu1 %v3053_v48, %s3308_s25  ;;  %3059 = vrot.lane.b32.xlu0 %v3048_v43, %s3309_s12  ;;  %v3622_v8 = vpop.f32.mrb[6].mxu0 }
 0x107   : > { %v3631_v11 = vpop.f32.mrb[7].mxu0 }
 0x10a   : > { %3064 = vrot.lane.b32.xlu1 %v3053_v48, %s3309_s12  ;;  %3069 = vrot.lane.b32.xlu0 %v3048_v43, %s3310_s29  ;;  %s3315_s12 = smov 120  }
 0x10e   : > { %3074 = vrot.lane.b32.xlu1 %v3053_v48, %s3310_s29  ;;  %3079 = vrot.lane.b32.xlu0 %v3048_v43, %s3311_s21  ;;  %s3312_s29 = smov 4  }
 0x112   : > { %3084 = vrot.lane.b32.xlu1 %v3053_v48, %s3311_s21  ;;  %511 = vperm.xlu0 %3046, %v449_v57  }
 0x116   : > { %516 = vperm.xlu1 %3047, %v450_v61   ;;  %521 = vperm.xlu0 %3046, %v451_v62  }
 0x11a   : > { %526 = vperm.xlu1 %3047, %v452_v3   ;;  %491 = vperm.xlu0 %3046, %v445_v4   ;;  %v987_v3 = vld [vmem:[%s4279_s5] sm:$0xff]  ;;  %v990_v4 = vld [vmem:[%s4279_s5 + $0x18] sm:$0xff] }
 0x11e   : > { %496 = vperm.xlu1 %3047, %v446_v9   ;;  %501 = vperm.xlu0 %3046, %v447_v10   ;;  %v991_v9 = vld [vmem:[%s4279_s5 + $0x20] sm:$0xff]  ;;  %v994_v10 = vld [vmem:[%s4279_s5 + $0x38] sm:$0xff] }
 0x122   : > { %506 = vperm.xlu1 %3047, %v448_v13   ;;  %1203 = vperm.xlu0 %3046, %v1193_v14   ;;  %v996_v13 = vld [vmem:[%s4279_s5 + $0x48] sm:$0xff]  ;;  %v995_v14 = vld [vmem:[%s4279_s5 + $0x40] sm:$0xff] }
 0x126   : > { %1208 = vperm.xlu1 %3047, %v1194_v15   ;;  %1213 = vperm.xlu0 %3046, %v1195_v16   ;;  %v998_v15 = vld [vmem:[%s4279_s5 + $0x58] sm:$0xff]  ;;  %v997_v16 = vld [vmem:[%s4279_s5 + $0x50] sm:$0xff] }
 0x12a   : > { %1218 = vperm.xlu1 %3047, %v1196_v17   ;;  %v1000_v17 = vld [vmem:[%s4279_s5 + $0x68] sm:$0xff] }
 0x174   : > { %v3050_v20 = vpop.permute.xlu0 %3049 }
 0x175   : > { %v3052_v21 = vunpack.i.h.bf16 %v3050_v20  ;;  %v3051_v22 = vunpack.i.l.bf16 %v3050_v20  ;;  %v1002_v20 = vld [vmem:[%s4279_s5 + $0x78] sm:$0xff] }
 0x177   : > { %v2828_v24 = vpack.c.bf16 %v3052_v21, %v3051_v22  ;;  %v1001_v21 = vld [vmem:[%s4279_s5 + $0x70] sm:$0xff]  ;;  %v3741_v22 = vpop.f32.mrb[4].mxu1 }
 0x178   : > { %v3055_v25 = vpop.permute.xlu1 %3054  ;;  %v3060_v26 = vpop.permute.xlu0 %3059 }
 0x179   : > { %v3057_v29 = vunpack.i.h.bf16 %v3055_v25  ;;  %v3056_v30 = vunpack.i.l.bf16 %v3055_v25  ;;  %2830 = vmatpush1.bf16.msk.msra.mxu1 %vm3656_vm4, %v2828_v24  ;;  %v3062_v32 = vunpack.i.h.bf16 %v3060_v26  ;;  %v3061_v33 = vunpack.i.l.bf16 %v3060_v26  ;;  %v3743_v24 = vpop.f32.mrb[5].mxu1 }
 0x17a   : > { %2831 = vmatprep.subr.bf16.mxu1 %v3307_v27  ;;  %v3745_v25 = vpop.f32.mrb[6].mxu1 }
 0x17b   : > { %v2832_v31 = vpack.c.bf16 %v3057_v29, %v3056_v30  ;;  %v2836_v37 = vpack.c.bf16 %v3062_v32, %v3061_v33  ;;  %v3747_v26 = vpop.f32.mrb[7].mxu1 }
 0x17c   : > { %v3065_v35 = vpop.permute.xlu1 %3064  ;;  %v3070_v42 = vpop.permute.xlu0 %3069 }
 0x17d   : > { %2834 = vmatpush1.bf16.msk.msra.mxu1 %vm3656_vm4, %v2832_v31  ;;  %v3067_v38 = vunpack.i.h.bf16 %v3065_v35  ;;  %v3066_v39 = vunpack.i.l.bf16 %v3065_v35  ;;  %v3072_v43 = vunpack.i.h.bf16 %v3070_v42  ;;  %v3071_v46 = vunpack.i.l.bf16 %v3070_v42  ;;  %v3749_v29 = vpop.f32.mrb[8].mxu1 }
 0x17e   : > { %2835 = vmatprep.subr.bf16.mxu1 %v3307_v27  ;;  %v3751_v30 = vpop.f32.mrb[9].mxu1 }
 0x17f   : > { %v2840_v40 = vpack.c.bf16 %v3067_v38, %v3066_v39  ;;  %v2850_v49 = vpack.c.bf16 %v3072_v43, %v3071_v46  ;;  %v3753_v31 = vpop.f32.mrb[10].mxu1  ;;  %v1185_v43 = vld [vmem:[%s4280_s6] sm:$0xff] }
 0x180   : > { %v3075_v48 = vpop.permute.xlu1 %3074  ;;  %v3080_v52 = vpop.permute.xlu0 %3079  ;;  %2766 = vmatprep.mubr.msk.f32.mxu0 %vm1023_vm2, %v1185_v43 }
 0x181   : > { %2838 = vmatpush1.bf16.msk.msra.mxu1 %vm2837_vm6, %v2836_v37  ;;  %v3077_v50 = vunpack.i.h.bf16 %v3075_v48  ;;  %v3076_v51 = vunpack.i.l.bf16 %v3075_v48  ;;  %v3082_v54 = vunpack.i.h.bf16 %v3080_v52  ;;  %v3081_v57 = vunpack.i.l.bf16 %v3080_v52  ;;  %v3755_v32 = vpop.f32.mrb[11].mxu1 }
 0x182   : > { %2839 = vmatprep.subr.bf16.mxu1 %v3307_v27  ;;  %v3757_v33 = vpop.f32.mrb[12].mxu1 }
 0x183   : > { %v2854_v53 = vpack.c.bf16 %v3077_v50, %v3076_v51  ;;  %v2858_v61 = vpack.c.bf16 %v3082_v54, %v3081_v57  ;;  %v3759_v35 = vpop.f32.mrb[13].mxu1 }
 0x184   : > { %v3085_v58 = vpop.permute.xlu1 %3084  ;;  %v3761_v37 = vpop.f32.mrb[14].mxu1 }
 0x185   : > { %2842 = vmatpush1.bf16.msk.msra.mxu1 %vm2837_vm6, %v2840_v40  ;;  %v3087_v62 = vunpack.i.h.bf16 %v3085_v58  ;;  %v3086_v0 = vunpack.i.l.bf16 %v3085_v58  ;;  %v3763_v38 = vpop.f32.mrb[15].mxu1 }
 0x186   : > { %2843 = vmatprep.subr.bf16.mxu1 %v3307_v27  ;;  %v3765_v39 = vpop.f32.mrb[16].mxu1 }
 0x187   : > { %v2862_v1 = vpack.c.bf16 %v3087_v62, %v3086_v0  ;;  %v3767_v40 = vpop.f32.mrb[17].mxu1 }
 0x189   : > { %2845 = vmatpush1.bf16.msra.mxu1 %v2844_v41  ;;  %v3769_v41 = vpop.f32.mrb[18].mxu1 }
 0x18a   : > { %2846 = vmatprep.subr.bf16.mxu1 %v3307_v27  ;;  %v3771_v42 = vpop.f32.mrb[19].mxu1 }
 0x18d   : > { %2848 = vmatpush1.bf16.msra.mxu1 %v2847_v47 }
 0x18e   : > { %2849 = vmatprep.subr.bf16.mxu1 %v3307_v27 }
 0x191   : > { %2852 = vmatpush1.bf16.msk.msra.mxu1 %vm2851_vm8, %v2850_v49  ;;  %v512_v46 = vpop.permute.xlu0 %511 }
 0x192   : > { %2853 = vmatprep.subr.bf16.mxu1 %v3307_v27 }
 0x195   : > { %2856 = vmatpush1.bf16.msk.msra.mxu1 %vm2851_vm8, %v2854_v53  ;;  %v517_v47 = vpop.permute.xlu1 %516  ;;  %v522_v48 = vpop.permute.xlu0 %521 }
 0x196   : > { %2857 = vmatprep.subr.bf16.mxu1 %v3307_v27  ;;  %v813_v43 = vadd.f32 %v3595_v63, %v522_v48 }
 0x199   : > { %2860 = vmatpush1.bf16.msk.msra.mxu1 %vm3679_vm10, %v2858_v61  ;;  %v527_v49 = vpop.permute.xlu1 %526  ;;  %v492_v50 = vpop.permute.xlu0 %491 }
 0x19a   : > { %2861 = vmatprep.subr.bf16.mxu1 %v3307_v27  ;;  %v783_v51 = vadd.f32 %v3613_v5, %v492_v50 }
 0x19d   : > { %2864 = vmatpush1.bf16.msk.msra.mxu1 %vm3679_vm10, %v2862_v1  ;;  %v497_v52 = vpop.permute.xlu1 %496  ;;  %v502_v61 = vpop.permute.xlu0 %501 }
 0x19e   : > { %2873 = vmatprep.subr.bf16.mxu1 %v3307_v27  ;;  %v788_v58 = vadd.f32 %v3604_v2, %v497_v52 }
 0x1a0   : > { %1113 = vmatmul.mubr.f32.vlgmr.msra.gmra.mrb[20].mxu1 %v987_v3  ;;  %v793_v3 = vadd.f32 %v3631_v11, %v502_v61 }
 0x1a1   : > { %2477 = vmatprep.mubr.msk.f32.mxu1 %vm1023_vm2, %v990_v4  ;;  %v507_v4 = vpop.permute.xlu1 %506 }
 0x1a4   : > { %1118 = vmatmul.mubr.f32.gmra.mrb[22].mxu1 %v989_v6 }
 0x1a5   : > { %2478 = vmatprep.mubr.msk.f32.mxu1 %vm1023_vm2, %v992_v7 }
 0x1a8   : > { %1123 = vmatmul.mubr.f32.gmra.mrb[24].mxu1 %v991_v9 }
 0x1a9   : > { %2479 = vmatprep.mubr.msk.f32.mxu1 %vm1023_vm2, %v994_v10  ;;  %v798_v10 = vadd.f32 %v3622_v8, %v507_v4 }
 0x1ac   : > { %1128 = vmatmul.mubr.f32.gmra.mrb[26].mxu1 %v993_v12 }
 0x1ad   : > { %2480 = vmatprep.mubr.msk.f32.mxu1 %vm1023_vm2, %v996_v13 }
 0x1b0   : > { %1133 = vmatmul.mubr.f32.gmra.mrb[28].mxu1 %v995_v14  ;;  %v803_v14 = vadd.f32 %v3572_v56, %v512_v46 }
 0x1b1   : > { %2481 = vmatprep.mubr.msk.f32.mxu1 %vm1023_vm2, %v998_v15 }
 0x1b4   : > { %1138 = vmatmul.mubr.f32.gmra.mrb[30].mxu1 %v997_v16 }
 0x1b5   : > { %2482 = vmatprep.mubr.msk.f32.mxu1 %vm1023_vm2, %v1000_v17  ;;  %v808_v17 = vadd.f32 %v3569_v55, %v517_v47 }
 0x1b8   : > { %1143 = vmatmul.mubr.f32.gmra.mrb[32].mxu1 %v999_v18 }
 0x1b9   : > { %2483 = vmatprep.mubr.msk.f32.mxu1 %vm1023_vm2, %v1002_v20 }
 0x1bc   : > { %1148 = vmatmul.mubr.f32.gmra.mrb[34].mxu1 %v1001_v21 }
 0x273   : > { %v1114_v53 = vpop.f32.mrb[20].mxu1 }
 0x274   : > { %v1115_v54 = vadd.f32 %v1114_v53, %v783_v51  ;;  %v1116_v57 = vpop.f32.mrb[21].mxu1  ;;  %v818_v53 = vadd.f32 %v3586_v60, %v527_v49 }
 0x277   : > { %v1119_v62 = vpop.f32.mrb[22].mxu1 }
 0x278   : > { %v1120_v0 = vadd.f32 %v1119_v62, %v788_v58  ;;  %v1121_v1 = vpop.f32.mrb[23].mxu1 }
 0x27b   : > { %v1124_v6 = vpop.f32.mrb[24].mxu1 }
 0x27c   : > { %v1125_v7 = vadd.f32 %v1124_v6, %v793_v3  ;;  %v1126_v9 = vpop.f32.mrb[25].mxu1 }
 0x27f   : > { %v1129_v12 = vpop.f32.mrb[26].mxu1 }
 0x280   : > { %v1130_v5 = vadd.f32 %v1129_v12, %v798_v10  ;;  %v1131_v13 = vpop.f32.mrb[27].mxu1 }
 0x283   : > { %v1134_v15 = vpop.f32.mrb[28].mxu1 }
 0x284   : > { %v1135_v16 = vadd.f32 %v1134_v15, %v803_v14  ;;  %v1136_v2 = vpop.f32.mrb[29].mxu1 }
 0x286   : > { %v2484_v18 = vmul.f32 -1.442695, %v1135_v16 }
 0x287   : > { %v1139_v20 = vpop.f32.mrb[30].mxu1 }
 0x288   : > { %3168 = vpow2.f32 %v2484_v18  ;;  %v1140_v11 = vadd.f32 %v1139_v20, %v808_v17  ;;  %v1141_v21 = vpop.f32.mrb[31].mxu1  ;;  %v1187_v17 = vld [vmem:[%s4280_s6 + $0x10] sm:$0xff]  ;;  %v1188_v18 = vld [vmem:[%s4280_s6 + $0x18] sm:$0xff]  ;;  %v1209_v20 = vpop.permute.xlu1 %1208 }
 0x28a   : > { %v2485_v50 = vmul.f32 -1.442695, %v1140_v11  ;;  %v1204_v11 = vpop.permute.xlu0 %1203 }
 0x28b   : > { %v1144_v51 = vpop.f32.mrb[32].mxu1 }
 0x28c   : > { %3170 = vpow2.f32 %v2485_v50  ;;  %v1145_v8 = vadd.f32 %v1144_v51, %v813_v43  ;;  %v1146_v52 = vpop.f32.mrb[33].mxu1 }
 0x28d   : > { %v1219_v52 = vpop.permute.xlu1 %1218 }
 0x28e   : > { %v2486_v56 = vmul.f32 -1.442695, %v1145_v8 }
 0x28f   : > { %v1149_v46 = vpop.f32.mrb[34].mxu1 }
 0x290   : > { %3172 = vpow2.f32 %v2486_v56  ;;  %v1150_v57 = vadd.f32 %v1149_v46, %v818_v53  ;;  %v1151_v58 = vpop.f32.mrb[35].mxu1  ;;  %v1214_v46 = vpop.permute.xlu0 %1213 }
 0x291   : > { %3174 = vtanh.f32 %v1115_v54 }
 0x292   : > { %v3169_v55 = vpop.eup %3168  ;;  %v2487_v47 = vmul.f32 -1.442695, %v1150_v57 }
 0x293   : > { %v1169_v61 = vadd.f32 1.0, %v3169_v55 }
 0x294   : > { %3176 = vpow2.f32 %v2487_v47 }
 0x295   : > { %3178 = vrcp.f32 %v1169_v61 }
 0x296   : > { %v3171_v62 = vpop.eup %3170  ;;  %3180 = vtanh.f32 %v1120_v0 }
 0x297   : > { %v1170_v63 = vadd.f32 1.0, %v3171_v62 }
 0x299   : > { %3182 = vrcp.f32 %v1170_v63 }
 0x29a   : > { %v3173_v48 = vpop.eup %3172  ;;  %3184 = vtanh.f32 %v1125_v7 }
 0x29b   : > { %v1171_v1 = vadd.f32 1.0, %v3173_v48  ;;  %v3175_v3 = vpop.eup %3174 }
 0x29d   : > { %3186 = vrcp.f32 %v1171_v1 }
 0x29e   : > { %v3177_v60 = vpop.eup %3176  ;;  %3188 = vtanh.f32 %v1130_v5  ;;  %v1186_v5 = vld [vmem:[%s4280_s6 + $0x8] sm:$0xff] }
 0x29f   : > { %v3179_v49 = vpop.eup %3178  ;;  %v1172_v4 = vadd.f32 1.0, %v3177_v60  ;;  %v453_v60 = vld [vmem:[%s4278_s4 + $0x60] sm:$0xff] }
 0x2a0   : > { %v1181_v6 = vmul.f32 %v3179_v49, %v3175_v3  ;;  %v3181_v9 = vpop.eup %3180  ;;  %v460_v3 = vld [vmem:[%s4278_s4 + $0x98] sm:$0xff]  ;;  %v454_v49 = vld [vmem:[%s4278_s4 + $0x68] sm:$0xff] }
 0x2a1   : > { %3190 = vrcp.f32 %v1172_v4  ;;  %v455_v4 = vld [vmem:[%s4278_s4 + $0x70] sm:$0xff] }
 0x2a3   : > { %v3183_v54 = vpop.eup %3182 }
 0x2a4   : > { %v1182_v10 = vmul.f32 %v3183_v54, %v3181_v9  ;;  %v3185_v12 = vpop.eup %3184  ;;  %v456_v9 = vld [vmem:[%s4278_s4 + $0x78] sm:$0xff]  ;;  %v2532_v54 = vld [vmem:[%s4281_s7 + $0x40] sm:$0xff] }
 0x2a6   : > { %v2865_v13 = vpack.c.bf16 %v1182_v10, %v1181_v6  ;;  %v2497_v6 = vld [vmem:[%s4279_s5 + $0x88] sm:$0xff] }
 0x2a7   : > { %v3187_v14 = vpop.eup %3186  ;;  %2512 = vmatprep.mubr.msk.f32.mxu1 %vm1023_vm2, %v2497_v6  ;;  %v2533_v10 = vld [vmem:[%s4281_s7 + $0x48] sm:$0xff] }
 0x2a8   : > { %2866 = vmatprep.subr.bf16.mxu0 %v2865_v13  ;;  %v1183_v0 = vmul.f32 %v3187_v14, %v3185_v12  ;;  %v3189_v15 = vpop.eup %3188  ;;  %v2534_v12 = vld [vmem:[%s4281_s7 + $0x50] sm:$0xff] }
 0x2a9   : > { %2868 = vmatpush3.bf16.msra.mxu0 %v2865_v13  ;;  %v2535_v13 = vld [vmem:[%s4281_s7 + $0x58] sm:$0xff] }
 0x2ab   : > { %v3191_v16 = vpop.eup %3190 }
 0x2ac   : > { %v1184_v7 = vmul.f32 %v3191_v16, %v3189_v15 }
 0x2ae   : > { %v2869_v2 = vpack.c.bf16 %v1184_v7, %v1183_v0 }
 0x2b0   : > { %2870 = vmatprep.subr.bf16.mxu0 %v2869_v2 }
 0x2b1   : > { %2872 = vmatpush3.bf16.msra.mxu0 %v2869_v2 }
 0x2b4   : > { %2767 = vmatmul.mubr.msk.f32.vlgmr.msra.gmra.mrb[8].mxu0 %vm1023_vm2, %v1186_v5 }
 0x2b5   : > { %2769 = vmatprep.mubr.msk.f32.mxu0 %vm1023_vm2, %v1187_v17 }
 0x2b8   : > { %2770 = vmatmul.mubr.msk.f32.gmra.mrb[10].mxu0 %vm1023_vm2, %v1188_v18 }
 0x387   : > { %v2768_v21 = vpop.f32.mrb[8].mxu0 }
 0x388   : > { %v1337_v43 = vadd.f32 %v2768_v21, %v1209_v20  ;;  %v1331_v50 = vpop.f32.mrb[9].mxu0 }
 0x389   : > { %v1332_v51 = vadd.f32 %v1331_v50, %v1204_v11 }
 0x38a   : > { %v1371_v8 = vadd.f32 %v1337_v43, %v3514_v34 }
 0x38b   : > { %v1370_v53 = vadd.f32 %v1332_v51, %v3517_v36  ;;  %v2771_v56 = vpop.f32.mrb[10].mxu0 }
 0x38c   : > { %v3800_v57 = vmul.f32 %v3511_v28, %v1371_v8  ;;  %v1347_v58 = vadd.f32 %v2771_v56, %v1219_v52  ;;  %v1341_v55 = vpop.f32.mrb[11].mxu0 }
 0x38d   : > { %v3803_v47 = vmul.f32 %v3511_v28, %v1370_v53  ;;  %v1342_v61 = vadd.f32 %v1341_v55, %v1214_v46 }
 0x38e   : > { %v1373_v62 = vadd.f32 %v1347_v58, %v3530_v44  ;;  %v458_v44 = vld [vmem:[%s4278_s4 + $0x88] sm:$0xff] }
 0x38f   : > { %v1372_v63 = vadd.f32 %v1342_v61, %v3533_v45  ;;  %v3088_v34 = vpack.i.bf16 %v3800_v57, %v3803_v47  ;;  %v459_v45 = vld [vmem:[%s4278_s4 + $0x90] sm:$0xff]  ;;  %v2890_v53 = vpack.c.bf16 %v3800_v57, %v3803_v47 }
 0x390   : > { %v3810_v36 = vmul.f32 %v3511_v28, %v1373_v62 }
 0x391   : > { %v3813_v48 = vmul.f32 %v3511_v28, %v1372_v63  ;;  %3089 = vrot.lane.b32.xlu0 %v3088_v34, %s3312_s29  ;;  %v457_v28 = vld [vmem:[%s4278_s4 + $0x80] sm:$0xff] }
 0x393   : > { %v3093_v1 = vpack.i.bf16 %v3810_v36, %v3813_v48  ;;  %v2893_v55 = vpack.c.bf16 %v3810_v36, %v3813_v48 }
 0x395   : > { %3094 = vrot.lane.b32.xlu1 %v3093_v1, %s3312_s29  ;;  %3099 = vrot.lane.b32.xlu0 %v3088_v34, %s3308_s25 }
 0x399   : > { %3104 = vrot.lane.b32.xlu1 %v3093_v1, %s3308_s25  ;;  %3109 = vrot.lane.b32.xlu0 %v3088_v34, %s3311_s21 }
 0x39d   : > { %3114 = vrot.lane.b32.xlu1 %v3093_v1, %s3311_s21  ;;  %3119 = vrot.lane.b32.xlu0 %v3088_v34, %s4286_s18 }
 0x3a1   : > { %3124 = vrot.lane.b32.xlu1 %v3093_v1, %s4286_s18  ;;  %551 = vperm.xlu0 %3046, %v457_v28  }
 0x3a5   : > { %556 = vperm.xlu1 %3047, %v458_v44   ;;  %561 = vperm.xlu0 %3046, %v459_v45  }
 0x3a9   : > { %566 = vperm.xlu1 %3047, %v460_v3   ;;  %531 = vperm.xlu0 %3046, %v453_v60   ;;  %v2550_v3 = vld [vmem:[%s4279_s5 + $0x110] sm:$0xff] }
 0x3ad   : > { %536 = vperm.xlu1 %3047, %v454_v49   ;;  %541 = vperm.xlu0 %3046, %v455_v4  }
 0x3b1   : > { %546 = vperm.xlu1 %3047, %v456_v9   ;;  %1672 = vperm.xlu0 %3046, %v2532_v54   ;;  %v2499_v9 = vld [vmem:[%s4279_s5 + $0x98] sm:$0xff]  ;;  %v2498_v54 = vld [vmem:[%s4279_s5 + $0x90] sm:$0xff] }
 0x3b5   : > { %1677 = vperm.xlu1 %3047, %v2533_v10   ;;  %1682 = vperm.xlu0 %3046, %v2534_v12   ;;  %v2501_v10 = vld [vmem:[%s4279_s5 + $0xa8] sm:$0xff]  ;;  %v2500_v12 = vld [vmem:[%s4279_s5 + $0xa0] sm:$0xff] }
 0x3b9   : > { %1687 = vperm.xlu1 %3047, %v2535_v13   ;;  %v2503_v13 = vld [vmem:[%s4279_s5 + $0xb8] sm:$0xff] }
 0x403   : > { %v3090_v14 = vpop.permute.xlu0 %3089 }
 0x404   : > { %v3092_v0 = vunpack.i.h.bf16 %v3090_v14  ;;  %v3091_v15 = vunpack.i.l.bf16 %v3090_v14  ;;  %v2502_v14 = vld [vmem:[%s4279_s5 + $0xb0] sm:$0xff] }
 0x406   : > { %v2874_v7 = vpack.c.bf16 %v3092_v0, %v3091_v15  ;;  %v2505_v0 = vld [vmem:[%s4279_s5 + $0xc8] sm:$0xff]  ;;  %v2504_v15 = vld [vmem:[%s4279_s5 + $0xc0] sm:$0xff] }
 0x407   : > { %v3095_v2 = vpop.permute.xlu1 %3094  ;;  %v3100_v5 = vpop.permute.xlu0 %3099 }
 0x408   : > { %v3097_v17 = vunpack.i.h.bf16 %v3095_v2  ;;  %v3096_v18 = vunpack.i.l.bf16 %v3095_v2  ;;  %2876 = vmatpush1.bf16.msk.msra.mxu1 %vm3866_vm12, %v2874_v7  ;;  %v3102_v11 = vunpack.i.h.bf16 %v3100_v5  ;;  %v3101_v21 = vunpack.i.l.bf16 %v3100_v5  ;;  %v2507_v7 = vld [vmem:[%s4279_s5 + $0xd8] sm:$0xff]  ;;  %v2506_v2 = vld [vmem:[%s4279_s5 + $0xd0] sm:$0xff]  ;;  %v2509_v5 = vld [vmem:[%s4279_s5 + $0xe8] sm:$0xff] }
 0x409   : > { %2877 = vmatprep.subr.bf16.mxu1 %v3307_v27 }
 0x40a   : > { %v2878_v20 = vpack.c.bf16 %v3097_v17, %v3096_v18  ;;  %v2882_v50 = vpack.c.bf16 %v3102_v11, %v3101_v21  ;;  %v2508_v17 = vld [vmem:[%s4279_s5 + $0xe0] sm:$0xff]  ;;  %v2511_v18 = vld [vmem:[%s4279_s5 + $0xf8] sm:$0xff]  ;;  %v1190_v21 = vld [vmem:[%s4280_s6 + $0x28] sm:$0xff] }
 0x40b   : > { %v3105_v43 = vpop.permute.xlu1 %3104  ;;  %v3110_v56 = vpop.permute.xlu0 %3109  ;;  %v1189_v11 = vld [vmem:[%s4280_s6 + $0x20] sm:$0xff] }
 0x40c   : > { %2880 = vmatpush1.bf16.msk.msra.mxu1 %vm3866_vm12, %v2878_v20  ;;  %v3107_v51 = vunpack.i.h.bf16 %v3105_v43  ;;  %v3106_v8 = vunpack.i.l.bf16 %v3105_v43  ;;  %v3112_v46 = vunpack.i.h.bf16 %v3110_v56  ;;  %v3111_v58 = vunpack.i.l.bf16 %v3110_v56  ;;  %v2510_v20 = vld [vmem:[%s4279_s5 + $0xf0] sm:$0xff]  ;;  %2772 = vmatprep.mubr.msk.f32.mxu0 %vm1023_vm2, %v1189_v11 }
 0x40d   : > { %2881 = vmatprep.subr.bf16.mxu1 %v3307_v27  ;;  %v1191_v43 = vld [vmem:[%s4280_s6 + $0x30] sm:$0xff]  ;;  %2773 = vmatmul.mubr.msk.f32.gmra.mrb[12].mxu0 %vm1023_vm2, %v1190_v21 }
 0x40e   : > { %v2886_v52 = vpack.c.bf16 %v3107_v51, %v3106_v8  ;;  %v2896_v23 = vpack.c.bf16 %v3112_v46, %v3111_v58  ;;  %2775 = vmatprep.mubr.msk.f32.mxu0 %vm1023_vm2, %v1191_v43  ;;  %v2524_v51 = vld [vmem:[%s4280_s6 + $0x40] sm:$0xff] }
 0x40f   : > { %v3115_v61 = vpop.permute.xlu1 %3114  ;;  %v3120_v34 = vpop.permute.xlu0 %3119 }
 0x410   : > { %2884 = vmatpush1.bf16.msk.msra.mxu1 %vm3656_vm4, %v2882_v50  ;;  %v3117_v62 = vunpack.i.h.bf16 %v3115_v61  ;;  %v3116_v63 = vunpack.i.l.bf16 %v3115_v61  ;;  %v3122_v28 = vunpack.i.h.bf16 %v3120_v34  ;;  %v3121_v44 = vunpack.i.l.bf16 %v3120_v34  ;;  %v1192_v50 = vld [vmem:[%s4280_s6 + $0x38] sm:$0xff] }
 0x411   : > { %2885 = vmatprep.subr.bf16.mxu1 %v3307_v27  ;;  %2776 = vmatmul.mubr.msk.f32.gmra.mrb[14].mxu0 %vm1023_vm2, %v1192_v50 }
 0x412   : > { %v2900_v1 = vpack.c.bf16 %v3117_v62, %v3116_v63  ;;  %v2904_v60 = vpack.c.bf16 %v3122_v28, %v3121_v44  ;;  %2786 = vmatprep.mubr.msk.f32.mxu0 %vm1023_vm2, %v2524_v51 }
 0x413   : > { %v3125_v45 = vpop.permute.xlu1 %3124 }
 0x414   : > { %2888 = vmatpush1.bf16.msk.msra.mxu1 %vm3656_vm4, %v2886_v52  ;;  %v3127_v49 = vunpack.i.h.bf16 %v3125_v45  ;;  %v3126_v4 = vunpack.i.l.bf16 %v3125_v45  ;;  %vm2951_vm4 = vmpackc.low %vm403_vm3, %vm403_vm3 }
 0x415   : > { %2889 = vmatprep.subr.bf16.mxu1 %v3307_v27 }
 0x416   : > { %v2908_v6 = vpack.c.bf16 %v3127_v49, %v3126_v4 }
 0x418   : > { %2891 = vmatpush1.bf16.msra.mxu1 %v2890_v53 }
 0x419   : > { %2892 = vmatprep.subr.bf16.mxu1 %v3307_v27 }
 0x41c   : > { %2894 = vmatpush1.bf16.msra.mxu1 %v2893_v55 }
 0x41d   : > { %2895 = vmatprep.subr.bf16.mxu1 %v3307_v27 }
 0x420   : > { %2898 = vmatpush1.bf16.msk.msra.mxu1 %vm3679_vm10, %v2896_v23  ;;  %v552_v8 = vpop.permute.xlu0 %551 }
 0x421   : > { %2899 = vmatprep.subr.bf16.mxu1 %v3307_v27 }
 0x424   : > { %2902 = vmatpush1.bf16.msk.msra.mxu1 %vm3679_vm10, %v2900_v1  ;;  %v557_v52 = vpop.permute.xlu1 %556  ;;  %v562_v53 = vpop.permute.xlu0 %561 }
 0x425   : > { %2903 = vmatprep.subr.bf16.mxu1 %v3307_v27 }
 0x428   : > { %2906 = vmatpush1.bf16.msk.msra.mxu1 %vm3895_vm14, %v2904_v60  ;;  %v567_v56 = vpop.permute.xlu1 %566  ;;  %v532_v46 = vpop.permute.xlu0 %531 }
 0x429   : > { %2907 = vmatprep.subr.bf16.mxu1 %v3307_v27  ;;  %v823_v58 = vadd.f32 %v3743_v24, %v532_v46 }
 0x42c   : > { %2910 = vmatpush1.bf16.msk.msra.mxu1 %vm3895_vm14, %v2908_v6  ;;  %v537_v55 = vpop.permute.xlu1 %536  ;;  %v542_v34 = vpop.permute.xlu0 %541 }
 0x42d   : > { %2965 = vmatprep.subr.bf16.mxu1 %v3307_v27  ;;  %v828_v63 = vadd.f32 %v3741_v22, %v537_v55  ;;  %v833_v45 = vadd.f32 %v3747_v26, %v542_v34 }
 0x42f   : > { %1580 = vmatmul.mubr.f32.vlgmr.msra.gmra.mrb[36].mxu1 %v2496_v59 }
 0x430   : > { %2513 = vmatprep.mubr.msk.f32.mxu1 %vm1023_vm2, %v2499_v9  ;;  %v547_v60 = vpop.permute.xlu1 %546 }
 0x431   : > { %v838_v59 = vadd.f32 %v3745_v25, %v547_v60 }
 0x433   : > { %1585 = vmatmul.mubr.f32.gmra.mrb[38].mxu1 %v2498_v54 }
 0x434   : > { %2514 = vmatprep.mubr.msk.f32.mxu1 %vm1023_vm2, %v2501_v10  ;;  %v843_v10 = vadd.f32 %v3751_v30, %v552_v8 }
 0x437   : > { %1590 = vmatmul.mubr.f32.gmra.mrb[40].mxu1 %v2500_v12 }
 0x438   : > { %2515 = vmatprep.mubr.msk.f32.mxu1 %vm1023_vm2, %v2503_v13 }
 0x43b   : > { %1595 = vmatmul.mubr.f32.gmra.mrb[42].mxu1 %v2502_v14  ;;  %v848_v14 = vadd.f32 %v3749_v29, %v557_v52 }
 0x43c   : > { %2516 = vmatprep.mubr.msk.f32.mxu1 %vm1023_vm2, %v2505_v0 }
 0x43f   : > { %1600 = vmatmul.mubr.f32.gmra.mrb[44].mxu1 %v2504_v15 }
 0x440   : > { %2517 = vmatprep.mubr.msk.f32.mxu1 %vm1023_vm2, %v2507_v7 }
 0x443   : > { %1605 = vmatmul.mubr.f32.gmra.mrb[46].mxu1 %v2506_v2  ;;  %v853_v2 = vadd.f32 %v3755_v32, %v562_v53 }
 0x444   : > { %2518 = vmatprep.mubr.msk.f32.mxu1 %vm1023_vm2, %v2509_v5 }
 0x447   : > { %1610 = vmatmul.mubr.f32.gmra.mrb[48].mxu1 %v2508_v17 }
 0x448   : > { %2519 = vmatprep.mubr.msk.f32.mxu1 %vm1023_vm2, %v2511_v18 }
 0x44b   : > { %1615 = vmatmul.mubr.f32.gmra.mrb[50].mxu1 %v2510_v20  ;;  %v858_v20 = vadd.f32 %v3753_v31, %v567_v56 }
 0x502   : > { %v1581_v61 = vpop.f32.mrb[36].mxu1 }
 0x503   : > { %v1582_v23 = vadd.f32 %v1581_v61, %v823_v58  ;;  %v1583_v62 = vpop.f32.mrb[37].mxu1 }
 0x506   : > { %v1586_v1 = vpop.f32.mrb[38].mxu1 }
 0x507   : > { %v1587_v28 = vadd.f32 %v1586_v1, %v828_v63  ;;  %v1588_v44 = vpop.f32.mrb[39].mxu1 }
 0x50a   : > { %v1591_v49 = vpop.f32.mrb[40].mxu1 }
 0x50b   : > { %v1592_v4 = vadd.f32 %v1591_v49, %v833_v45  ;;  %v1593_v6 = vpop.f32.mrb[41].mxu1 }
 0x50c   : > { %v2526_v6 = vld [vmem:[%s4280_s6 + $0x50] sm:$0xff] }
 0x50e   : > { %v1596_v9 = vpop.f32.mrb[42].mxu1 }
 0x50f   : > { %v1597_v24 = vadd.f32 %v1596_v9, %v838_v59  ;;  %v1598_v54 = vpop.f32.mrb[43].mxu1  ;;  %v2527_v59 = vld [vmem:[%s4280_s6 + $0x58] sm:$0xff]  ;;  %v1678_v9 = vpop.permute.xlu1 %1677 }
 0x512   : > { %v1601_v12 = vpop.f32.mrb[44].mxu1 }
 0x513   : > { %v1602_v13 = vadd.f32 %v1601_v12, %v843_v10  ;;  %v1603_v22 = vpop.f32.mrb[45].mxu1 }
 0x515   : > { %v2520_v0 = vmul.f32 -1.442695, %v1602_v13 }
 0x516   : > { %v1606_v15 = vpop.f32.mrb[46].mxu1 }
 0x517   : > { %3192 = vpow2.f32 %v2520_v0  ;;  %v1607_v26 = vadd.f32 %v1606_v15, %v848_v14  ;;  %v1608_v7 = vpop.f32.mrb[47].mxu1  ;;  %v1688_v14 = vpop.permute.xlu1 %1687 }
 0x518   : > { %v4001_v7 = vld [vmem:[%s3507_s22] ss:$0 sm:$0xff]  ;;  %s3314_s22 = smov 8  }
 0x519   : > { %v2521_v5 = vmul.f32 -1.442695, %v1607_v26 }
 0x51a   : > { %v1611_v17 = vpop.f32.mrb[48].mxu1 }
 0x51b   : > { %3194 = vpow2.f32 %v2521_v5  ;;  %v1612_v25 = vadd.f32 %v1611_v17, %v853_v2  ;;  %v1613_v18 = vpop.f32.mrb[49].mxu1 }
 0x51d   : > { %v2522_v30 = vmul.f32 -1.442695, %v1612_v25 }
 0x51e   : > { %v1616_v11 = vpop.f32.mrb[50].mxu1 }
 0x51f   : > { %3196 = vpow2.f32 %v2522_v30  ;;  %v1617_v21 = vadd.f32 %v1616_v11, %v858_v20  ;;  %v1618_v43 = vpop.f32.mrb[51].mxu1 }
 0x520   : > { %3198 = vtanh.f32 %v1582_v23 }
 0x521   : > { %v3193_v29 = vpop.eup %3192  ;;  %v2523_v50 = vmul.f32 -1.442695, %v1617_v21 }
 0x522   : > { %v1636_v51 = vadd.f32 1.0, %v3193_v29  ;;  %v466_v29 = vld [vmem:[%s4278_s4 + $0xc8] sm:$0xff] }
 0x523   : > { %3200 = vpow2.f32 %v2523_v50  ;;  %v467_v50 = vld [vmem:[%s4278_s4 + $0xd0] sm:$0xff] }
 0x524   : > { %3202 = vrcp.f32 %v1636_v51  ;;  %v2528_v51 = vld [vmem:[%s4280_s6 + $0x60] sm:$0xff] }
 0x525   : > { %v3195_v8 = vpop.eup %3194  ;;  %3204 = vtanh.f32 %v1587_v28 }
 0x526   : > { %v1637_v32 = vadd.f32 1.0, %v3195_v8  ;;  %v2529_v8 = vld [vmem:[%s4280_s6 + $0x68] sm:$0xff] }
 0x528   : > { %3206 = vrcp.f32 %v1637_v32  ;;  %v468_v32 = vld [vmem:[%s4278_s4 + $0xd8] sm:$0xff] }
 0x529   : > { %v3197_v52 = vpop.eup %3196  ;;  %3208 = vtanh.f32 %v1592_v4  ;;  %v2525_v4 = vld [vmem:[%s4280_s6 + $0x48] sm:$0xff] }
 0x52a   : > { %v1638_v53 = vadd.f32 1.0, %v3197_v52  ;;  %v3199_v46 = vpop.eup %3198  ;;  %v461_v52 = vld [vmem:[%s4278_s4 + $0xa0] sm:$0xff] }
 0x52c   : > { %3210 = vrcp.f32 %v1638_v53  ;;  %v2530_v53 = vld [vmem:[%s4280_s6 + $0x70] sm:$0xff] }
 0x52d   : > { %v3201_v31 = vpop.eup %3200  ;;  %3212 = vtanh.f32 %v1597_v24  ;;  %v1673_v24 = vpop.permute.xlu0 %1672 }
 0x52e   : > { %v3203_v56 = vpop.eup %3202  ;;  %v1639_v58 = vadd.f32 1.0, %v3201_v31  ;;  %v462_v31 = vld [vmem:[%s4278_s4 + $0xa8] sm:$0xff] }
 0x52f   : > { %v1648_v55 = vmul.f32 %v3203_v56, %v3199_v46  ;;  %v3205_v61 = vpop.eup %3204  ;;  %v2531_v46 = vld [vmem:[%s4280_s6 + $0x78] sm:$0xff]  ;;  %v463_v56 = vld [vmem:[%s4278_s4 + $0xb0] sm:$0xff] }
 0x530   : > { %3214 = vrcp.f32 %v1639_v58  ;;  %v2549_v58 = vld [vmem:[%s4279_s5 + $0x108] sm:$0xff] }
 0x531   : > { %v1683_v26 = vpop.permute.xlu0 %1682 }
 0x532   : > { %v3207_v23 = vpop.eup %3206 }
 0x533   : > { %v1649_v62 = vmul.f32 %v3207_v23, %v3205_v61  ;;  %v3209_v63 = vpop.eup %3208  ;;  %v1197_v61 = vld [vmem:[%s4281_s7 + $0x20] sm:$0xff]  ;;  %v1198_v23 = vld [vmem:[%s4281_s7 + $0x28] sm:$0xff] }
 0x535   : > { %v2911_v34 = vpack.c.bf16 %v1649_v62, %v1648_v55  ;;  %v464_v55 = vld [vmem:[%s4278_s4 + $0xb8] sm:$0xff]  ;;  %v2536_v62 = vld [vmem:[%s4281_s7 + $0x60] sm:$0xff] }
 0x536   : > { %v3211_v1 = vpop.eup %3210 }
 0x537   : > { %2912 = vmatprep.subr.bf16.mxu0 %v2911_v34  ;;  %v1650_v28 = vmul.f32 %v3211_v1, %v3209_v63  ;;  %v3213_v44 = vpop.eup %3212  ;;  %v2537_v63 = vld [vmem:[%s4281_s7 + $0x68] sm:$0xff] }
 0x538   : > { %2914 = vmatpush3.bf16.msra.mxu0 %v2911_v34  ;;  %v2580_v34 = vld [vmem:[%s4281_s7 + $0x80] sm:$0xff]  ;;  %v2581_v1 = vld [vmem:[%s4281_s7 + $0x88] sm:$0xff] }
 0x53a   : > { %v3215_v45 = vpop.eup %3214 }
 0x53b   : > { %v1651_v60 = vmul.f32 %v3215_v45, %v3213_v44  ;;  %v1200_v44 = vld [vmem:[%s4281_s7 + $0x38] sm:$0xff]  ;;  %v2538_v45 = vld [vmem:[%s4281_s7 + $0x70] sm:$0xff] }
 0x53d   : > { %v2915_v49 = vpack.c.bf16 %v1651_v60, %v1650_v28  ;;  %v1199_v28 = vld [vmem:[%s4281_s7 + $0x30] sm:$0xff]  ;;  %v2539_v60 = vld [vmem:[%s4281_s7 + $0x78] sm:$0xff] }
 0x53f   : > { %2916 = vmatprep.subr.bf16.mxu0 %v2915_v49 }
 0x540   : > { %2918 = vmatpush3.bf16.msra.mxu0 %v2915_v49  ;;  %v2582_v49 = vld [vmem:[%s4281_s7 + $0x90] sm:$0xff] }
 0x541   : > { %2919 = vmatprep.subr.bf16.mxu0 %v3307_v27 }
 0x543   : > { %2787 = vmatmul.mubr.msk.f32.vlgmr.msra.gmra.mrb[16].mxu0 %vm1023_vm2, %v2525_v4  ;;  %v2583_v4 = vld [vmem:[%s4281_s7 + $0x98] sm:$0xff] }
 0x544   : > { %2789 = vmatprep.mubr.msk.f32.mxu0 %vm1023_vm2, %v2526_v6  ;;  %v2257_v6 = vld [vmem:[%s4283_s9] sm:$0xf] }
 0x547   : > { %2790 = vmatmul.mubr.msk.f32.gmra.mrb[18].mxu0 %vm1023_vm2, %v2527_v59 }
 0x548   : > { %2792 = vmatprep.mubr.msk.f32.mxu0 %vm1023_vm2, %v2528_v51 }
 0x54b   : > { %2793 = vmatmul.mubr.msk.f32.gmra.mrb[12].mxu0 %vm1023_vm2, %v2529_v8 }
 0x54c   : > { %2795 = vmatprep.mubr.msk.f32.mxu0 %vm1023_vm2, %v2530_v53  ;;  %v2553_v53 = vld [vmem:[%s4279_s5 + $0x128] sm:$0xff] }
 0x54f   : > { %2796 = vmatmul.mubr.msk.f32.gmra.mrb[14].mxu0 %vm1023_vm2, %v2531_v46  ;;  %v2552_v46 = vld [vmem:[%s4279_s5 + $0x120] sm:$0xff] }
 0x550   : > { %2564 = vmatprep.mubr.msk.f32.mxu0 %vm1023_vm2, %v2549_v58  ;;  %v2557_v58 = vld [vmem:[%s4279_s5 + $0x148] sm:$0xff] }
 0x616   : > { %v2788_v54 = vpop.f32.mrb[16].mxu0 }
 0x617   : > { %v1806_v10 = vadd.f32 %v2788_v54, %v1678_v9  ;;  %v1800_v12 = vpop.f32.mrb[17].mxu0 }
 0x618   : > { %v1801_v13 = vadd.f32 %v1800_v12, %v1673_v24 }
 0x619   : > { %v1840_v22 = vadd.f32 %v1806_v10, %v3800_v57 }
 0x61a   : > { %v1839_v0 = vadd.f32 %v1801_v13, %v3803_v47  ;;  %v2791_v15 = vpop.f32.mrb[18].mxu0 }
 0x61b   : > { %v4004_v2 = vmul.f32 %v4001_v7, %v1840_v22  ;;  %v1816_v5 = vadd.f32 %v2791_v15, %v1688_v14  ;;  %v1810_v17 = vpop.f32.mrb[19].mxu0 }
 0x61c   : > { %v4007_v25 = vmul.f32 %v4001_v7, %v1839_v0  ;;  %v1811_v18 = vadd.f32 %v1810_v17, %v1683_v26 }
 0x61d   : > { %v1842_v20 = vadd.f32 %v1816_v5, %v3810_v36 }
 0x61e   : > { %v1841_v57 = vadd.f32 %v1811_v18, %v3813_v48  ;;  %v3128_v47 = vpack.i.bf16 %v4004_v2, %v4007_v25  ;;  %v2936_v11 = vpack.c.bf16 %v4004_v2, %v4007_v25  ;;  %v465_v48 = vld [vmem:[%s4278_s4 + $0xc0] sm:$0xff] }
 0x61f   : > { %v4014_v30 = vmul.f32 %v4001_v7, %v1842_v20 }
 0x620   : > { %v4019_v21 = vmul.f32 %v4001_v7, %v1841_v57  ;;  %3129 = vrot.lane.b32.xlu0 %v3128_v47, %s3314_s22 }
 0x622   : > { %v3133_v43 = vpack.i.bf16 %v4014_v30, %v4019_v21  ;;  %v2939_v36 = vpack.c.bf16 %v4014_v30, %v4019_v21 }
 0x624   : > { %3134 = vrot.lane.b32.xlu1 %v3133_v43, %s3314_s22  ;;  %3139 = vrot.lane.b32.xlu0 %v3128_v47, %s3312_s29  ;;  %s2442_s22 = sshll.u32 %s374_s15, 3 }
 0x628   : > { %3144 = vrot.lane.b32.xlu1 %v3133_v43, %s3312_s29  ;;  %3149 = vrot.lane.b32.xlu0 %v3128_v47, %s4300_s20 }
 0x62c   : > { %3154 = vrot.lane.b32.xlu1 %v3133_v43, %s4300_s20  ;;  %3159 = vrot.lane.b32.xlu0 %v3128_v47, %s3315_s12  ;;  %s2590_s20 = sshll.u32 %s3395_s17, 7  ;;  %s3318_s17 = smov [#allocation3]  }
 0x62d   : > { %s4230_s27 = scalar_lea.hbm %s4284_s10, %s2590_s20  ;;  %s3246_s29 = sshll.u32 %s3318_s17, 4  ;;  %s3247_s29 = int_to_ptr.vmem [resolvable:$false] %s3246_s29 }
 0x62e   : > { %s3248_s18 = scalar_lea.vmem %s3247_s29, 256 }
 0x630   : > { %3164 = vrot.lane.b32.xlu1 %v3133_v43, %s3315_s12  ;;  %591 = vperm.xlu0 %3046, %v465_v48   ;;  %s376_s12 = scalar_lea.vmem [#allocation3], %s2442_s22 }
 0x631   : > { %s2358_s26 = sshll.u32 %s376_s12, 4  ;;  %s4232_s26 = int_to_ptr.vmem [resolvable:$true] %s2358_s26 }
 0x632   : > { %s3242_s11 = scalar_lea.vmem %s4232_s26, 128  ;;  %p3249_p0 = scmp.lt.s32.totalorder %s4232_s26, %s3247_s29 }
 0x633   : > { %p3243_p11 = scmp.ne.s32.totalorder %s4232_s26, %s3242_s11  ;;  %p3250_p1 = scmp.lt.s32.totalorder %s3248_s18, %s3242_s11 }
 0x634   : > { %596 = vperm.xlu1 %3047, %v466_v29   ;;  %601 = vperm.xlu0 %3046, %v467_v50  }
 0x635   : > { %p3244_p12 = pnand %p3243_p11, %p3412_p5  ;;  %p3251_p2 = por %p3250_p1, %p3249_p0 }
 0x637   : > { %p3245_p13 = pneg %p3244_p12 }
 0x638   : > { %606 = vperm.xlu1 %3047, %v468_v32   ;;  %571 = vperm.xlu0 %3046, %v461_v52   ;;  %v2548_v52 = vld [vmem:[%s4279_s5 + $0x100] sm:$0xff] }
 0x639   : > { %p3252_p3 = pnand %p3251_p2, %p3245_p13 }
 0x63c   : > { %576 = vperm.xlu1 %3047, %v462_v31   ;;  %581 = vperm.xlu0 %3046, %v463_v56   ;;  %v2555_v31 = vld [vmem:[%s4279_s5 + $0x138] sm:$0xff]  ;;  %v2554_v56 = vld [vmem:[%s4279_s5 + $0x130] sm:$0xff] }
 0x640   : > { %586 = vperm.xlu1 %3047, %v464_v55   ;;  %1223 = vperm.xlu0 %3046, %v1197_v61   ;;  %v2556_v55 = vld [vmem:[%s4279_s5 + $0x140] sm:$0xff]  ;;  %v2559_v61 = vld [vmem:[%s4279_s5 + $0x158] sm:$0xff] }
 0x644   : > { %1228 = vperm.xlu1 %3047, %v1198_v23   ;;  %1692 = vperm.xlu0 %3046, %v2536_v62   ;;  %v2558_v23 = vld [vmem:[%s4279_s5 + $0x150] sm:$0xff]  ;;  %v2561_v62 = vld [vmem:[%s4279_s5 + $0x168] sm:$0xff] }
 0x648   : > { %1697 = vperm.xlu1 %3047, %v2537_v63   ;;  %2133 = vperm.xlu0 %3046, %v2580_v34   ;;  %v2560_v63 = vld [vmem:[%s4279_s5 + $0x160] sm:$0xff]  ;;  %v2563_v34 = vld [vmem:[%s4279_s5 + $0x178] sm:$0xff] }
 0x64c   : > { %2138 = vperm.xlu1 %3047, %v2581_v1   ;;  %1233 = vperm.xlu0 %3046, %v1199_v28   ;;  %v2562_v1 = vld [vmem:[%s4279_s5 + $0x170] sm:$0xff]  ;;  %v2576_v28 = vld [vmem:[%s4280_s6 + $0x80] sm:$0xff] }
 0x650   : > { %1238 = vperm.xlu1 %3047, %v1200_v44   ;;  %1702 = vperm.xlu0 %3046, %v2538_v45  }
 0x654   : > { %1707 = vperm.xlu1 %3047, %v2539_v60   ;;  %2143 = vperm.xlu0 %3046, %v2582_v49  }
 0x658   : > { %2148 = vperm.xlu1 %3047, %v2583_v4   ;;  %2260 = vperm.xlu0 %3046, %v2257_v6  }
 0x692   : > { %v3130_v59 = vpop.permute.xlu0 %3129 }
 0x693   : > { %v3132_v9 = vunpack.i.h.bf16 %v3130_v59  ;;  %v3131_v24 = vunpack.i.l.bf16 %v3130_v59 }
 0x695   : > { %v2920_v54 = vpack.c.bf16 %v3132_v9, %v3131_v24 }
 0x696   : > { %v3135_v10 = vpop.permute.xlu1 %3134  ;;  %v3140_v12 = vpop.permute.xlu0 %3139 }
 0x697   : > { %v3137_v13 = vunpack.i.h.bf16 %v3135_v10  ;;  %v3136_v22 = vunpack.i.l.bf16 %v3135_v10  ;;  %2922 = vmatpush1.bf16.msk.msra.mxu0 %vm2921_vm0, %v2920_v54  ;;  %v3142_v0 = vunpack.i.h.bf16 %v3140_v12  ;;  %v3141_v15 = vunpack.i.l.bf16 %v3140_v12 }
 0x698   : > { %2923 = vmatprep.subr.bf16.mxu0 %v3307_v27 }
 0x699   : > { %v2924_v14 = vpack.c.bf16 %v3137_v13, %v3136_v22  ;;  %v2928_v5 = vpack.c.bf16 %v3142_v0, %v3141_v15 }
 0x69a   : > { %v3145_v26 = vpop.permute.xlu1 %3144  ;;  %v3150_v57 = vpop.permute.xlu0 %3149 }
 0x69b   : > { %2926 = vmatpush1.bf16.msk.msra.mxu0 %vm2921_vm0, %v2924_v14  ;;  %v3147_v17 = vunpack.i.h.bf16 %v3145_v26  ;;  %v3146_v18 = vunpack.i.l.bf16 %v3145_v26  ;;  %v3152_v47 = vunpack.i.h.bf16 %v3150_v57  ;;  %v3151_v43 = vunpack.i.l.bf16 %v3150_v57 }
 0x69c   : > { %2927 = vmatprep.subr.bf16.mxu0 %v3307_v27 }
 0x69d   : > { %v2932_v20 = vpack.c.bf16 %v3147_v17, %v3146_v18  ;;  %v2942_v16 = vpack.c.bf16 %v3152_v47, %v3151_v43 }
 0x69e   : > { %v3155_v48 = vpop.permute.xlu1 %3154  ;;  %v3160_v51 = vpop.permute.xlu0 %3159 }
 0x69f   : > { %2930 = vmatpush1.bf16.msk.msra.mxu0 %vm3866_vm12, %v2928_v5  ;;  %v3157_v29 = vunpack.i.h.bf16 %v3155_v48  ;;  %v3156_v50 = vunpack.i.l.bf16 %v3155_v48  ;;  %v3162_v25 = vunpack.i.h.bf16 %v3160_v51 }
 0x6a0   : > { %2931 = vmatprep.subr.bf16.mxu0 %v3307_v27 }
 0x6a1   : > { %v2946_v2 = vpack.c.bf16 %v3157_v29, %v3156_v50 }
 0x6a2   : > { %v3165_v8 = vpop.permute.xlu1 %3164 }
 0x6a3   : > { %2934 = vmatpush1.bf16.msk.msra.mxu0 %vm3866_vm12, %v2932_v20  ;;  %v3167_v21 = vunpack.i.h.bf16 %v3165_v8 }
 0x6a4   : > { %2935 = vmatprep.subr.bf16.mxu0 %v3307_v27 }
 0x6a7   : > { %2937 = vmatpush1.bf16.msra.mxu0 %v2936_v11  ;;  %v3161_v11 = vunpack.i.l.bf16 %v3160_v51 }
 0x6a8   : > { %2938 = vmatprep.subr.bf16.mxu0 %v3307_v27 }
 0x6a9   : > { %v2950_v30 = vpack.c.bf16 %v3162_v25, %v3161_v11 }
 0x6ab   : > { %2940 = vmatpush1.bf16.msra.mxu0 %v2939_v36  ;;  %v3166_v36 = vunpack.i.l.bf16 %v3165_v8 }
 0x6ac   : > { %2941 = vmatprep.subr.bf16.mxu0 %v3307_v27 }
 0x6ad   : > { %v2954_v32 = vpack.c.bf16 %v3167_v21, %v3166_v36 }
 0x6af   : > { %2944 = vmatpush1.bf16.msk.msra.mxu0 %vm3895_vm14, %v2942_v16  ;;  %v592_v44 = vpop.permute.xlu0 %591 }
 0x6b0   : > { %2945 = vmatprep.subr.bf16.mxu0 %v3307_v27  ;;  %v883_v47 = vadd.f32 %v3767_v40, %v592_v44 }
 0x6b3   : > { %2948 = vmatpush1.bf16.msk.msra.mxu0 %vm3895_vm14, %v2946_v2  ;;  %v597_v45 = vpop.permute.xlu1 %596  ;;  %v602_v60 = vpop.permute.xlu0 %601 }
 0x6b4   : > { %2949 = vmatprep.subr.bf16.mxu0 %v3307_v27  ;;  %v888_v16 = vadd.f32 %v3765_v39, %v597_v45  ;;  %v893_v2 = vadd.f32 %v3771_v42, %v602_v60 }
 0x6b7   : > { %2952 = vmatpush1.bf16.msk.msra.mxu0 %vm2951_vm4, %v2950_v30  ;;  %v607_v49 = vpop.permute.xlu1 %606  ;;  %v572_v4 = vpop.permute.xlu0 %571 }
 0x6b8   : > { %2953 = vmatprep.subr.bf16.mxu0 %v3307_v27  ;;  %v863_v6 = vadd.f32 %v3759_v35, %v572_v4  ;;  %v898_v30 = vadd.f32 %v3769_v41, %v607_v49  ;;  %v2577_v4 = vld [vmem:[%s4280_s6 + $0x88] sm:$0xff] }
 0x6bb   : > { %2956 = vmatpush1.bf16.msk.msra.mxu0 %vm2951_vm4, %v2954_v32  ;;  %v577_v59 = vpop.permute.xlu1 %576  ;;  %v582_v12 = vpop.permute.xlu0 %581 }
 0x6bc   : > { %v868_v10 = vadd.f32 %v3757_v33, %v577_v59  ;;  %v873_v0 = vadd.f32 %v3763_v38, %v582_v12  ;;  %v2579_v59 = vld [vmem:[%s4280_s6 + $0x98] sm:$0xff] }
 0x6be   : > { %2049 = vmatmul.mubr.f32.vlgmr.msra.gmra.mrb[20].mxu0 %v2548_v52 }
 0x6bf   : > { %2565 = vmatprep.mubr.msk.f32.mxu0 %vm1023_vm2, %v2551_v19  ;;  %v587_v15 = vpop.permute.xlu1 %586 }
 0x6c0   : > { %v878_v18 = vadd.f32 %v3761_v37, %v587_v15 }
 0x6c2   : > { %2054 = vmatmul.mubr.f32.gmra.mrb[22].mxu0 %v2550_v3 }
 0x6c3   : > { %2566 = vmatprep.mubr.msk.f32.mxu0 %vm1023_vm2, %v2553_v53 }
 0x6c6   : > { %2059 = vmatmul.mubr.f32.gmra.mrb[24].mxu0 %v2552_v46 }
 0x6c7   : > { %2567 = vmatprep.mubr.msk.f32.mxu0 %vm1023_vm2, %v2555_v31 }
 0x6ca   : > { %2064 = vmatmul.mubr.f32.gmra.mrb[26].mxu0 %v2554_v56 }
 0x6cb   : > { %2568 = vmatprep.mubr.msk.f32.mxu0 %vm1023_vm2, %v2557_v58 }
 0x6ce   : > { %2069 = vmatmul.mubr.f32.gmra.mrb[28].mxu0 %v2556_v55 }
 0x6cf   : > { %2569 = vmatprep.mubr.msk.f32.mxu0 %vm1023_vm2, %v2559_v61 }
 0x6d2   : > { %2074 = vmatmul.mubr.f32.gmra.mrb[30].mxu0 %v2558_v23 }
 0x6d3   : > { %2570 = vmatprep.mubr.msk.f32.mxu0 %vm1023_vm2, %v2561_v62 }
 0x6d6   : > { %2079 = vmatmul.mubr.f32.gmra.mrb[32].mxu0 %v2560_v63 }
 0x6d7   : > { %2571 = vmatprep.mubr.msk.f32.mxu0 %vm1023_vm2, %v2563_v34 }
 0x6da   : > { %2084 = vmatmul.mubr.f32.gmra.mrb[34].mxu0 %v2562_v1 }
 0x6db   : > { %2806 = vmatprep.mubr.msk.f32.mxu0 %vm1023_vm2, %v2576_v28 }
 0x791   : > { %v2050_v9 = vpop.f32.mrb[20].mxu0 }
 0x792   : > { %v2051_v24 = vadd.f32 %v2050_v9, %v863_v6  ;;  %v2052_v54 = vpop.f32.mrb[21].mxu0  ;;  %v2578_v6 = vld [vmem:[%s4280_s6 + $0x90] sm:$0xff]  ;;  %v3317_v9 = vmov 0.0  }
 0x793   : > { %2820 = vmatprep.mubr.msk.f32.mxu1 %vm3316_vm5, %v3317_v9  ;;  %v1224_v54 = vpop.permute.xlu0 %1223 }
 0x795   : > { %v2055_v13 = vpop.f32.mrb[22].mxu0 }
 0x796   : > { %v2056_v22 = vadd.f32 %v2055_v13, %v868_v10  ;;  %v2057_v14 = vpop.f32.mrb[23].mxu0 }
 0x797   : > { %v1693_v12 = vpop.permute.xlu0 %1692 }
 0x799   : > { %v2060_v26 = vpop.f32.mrb[24].mxu0 }
 0x79a   : > { %v2061_v5 = vadd.f32 %v2060_v26, %v873_v0  ;;  %v2062_v17 = vpop.f32.mrb[25].mxu0 }
 0x79b   : > { %v2978_v17 = vadd.f32 %v1693_v12, %v1224_v54 }
 0x79d   : > { %v2065_v20 = vpop.f32.mrb[26].mxu0 }
 0x79e   : > { %v2066_v35 = vadd.f32 %v2065_v20, %v878_v18  ;;  %v2067_v57 = vpop.f32.mrb[27].mxu0 }
 0x7a1   : > { %v2070_v43 = vpop.f32.mrb[28].mxu0 }
 0x7a2   : > { %v2071_v48 = vadd.f32 %v2070_v43, %v883_v47  ;;  %v2072_v33 = vpop.f32.mrb[29].mxu0 }
 0x7a4   : > { %v2572_v29 = vmul.f32 -1.442695, %v2071_v48 }
 0x7a5   : > { %v2075_v50 = vpop.f32.mrb[30].mxu0 }
 0x7a6   : > { %3216 = vpow2.f32 %v2572_v29  ;;  %v2076_v38 = vadd.f32 %v2075_v50, %v888_v16  ;;  %v2077_v51 = vpop.f32.mrb[31].mxu0 }
 0x7a8   : > { %v2573_v25 = vmul.f32 -1.442695, %v2076_v38 }
 0x7a9   : > { %v2080_v11 = vpop.f32.mrb[32].mxu0 }
 0x7aa   : > { %3218 = vpow2.f32 %v2573_v25  ;;  %v2081_v37 = vadd.f32 %v2080_v11, %v893_v2  ;;  %v2082_v8 = vpop.f32.mrb[33].mxu0 }
 0x7ac   : > { %v2574_v40 = vmul.f32 -1.442695, %v2081_v37 }
 0x7ad   : > { %v2085_v21 = vpop.f32.mrb[34].mxu0 }
 0x7ae   : > { %3220 = vpow2.f32 %v2574_v40  ;;  %v2086_v36 = vadd.f32 %v2085_v21, %v898_v30  ;;  %v2087_v32 = vpop.f32.mrb[35].mxu0 }
 0x7af   : > { %3222 = vtanh.f32 %v2051_v24  ;;  %v1229_v24 = vpop.permute.xlu1 %1228  ;;  %v2256_v32 = vld [vmem:[%s4282_s8] sm:$0xf] }
 0x7b0   : > { %v3217_v39 = vpop.eup %3216  ;;  %v2575_v52 = vmul.f32 -1.442695, %v2086_v36 }
 0x7b1   : > { %v2105_v19 = vadd.f32 1.0, %v3217_v39  ;;  %v391_v39 = vld [vmem:[%s3450_s30 + $0x4] sm:$0xf] }
 0x7b2   : > { %3224 = vpow2.f32 %v2575_v52 }
 0x7b3   : > { %3226 = vrcp.f32 %v2105_v19  ;;  %v1698_v10 = vpop.permute.xlu1 %1697 }
 0x7b4   : > { %v3219_v3 = vpop.eup %3218  ;;  %3228 = vtanh.f32 %v2056_v22  ;;  %v2134_v22 = vpop.permute.xlu0 %2133 }
 0x7b5   : > { %v2106_v42 = vadd.f32 1.0, %v3219_v3  ;;  %v2979_v20 = vadd.f32 %v2978_v17, %v2134_v22 }
 0x7b7   : > { %3230 = vrcp.f32 %v2106_v42  ;;  %v2139_v13 = vpop.permute.xlu1 %2138  ;;  %v2337_v42 = vmul.f32 %v4001_v7, %v391_v39 }
 0x7b8   : > { %v3221_v53 = vpop.eup %3220  ;;  %3232 = vtanh.f32 %v2061_v5  ;;  %v1234_v0 = vpop.permute.xlu0 %1233  ;;  %v2975_v5 = vadd.f32 %v1698_v10, %v1229_v24 }
 0x7b9   : > { %v2107_v46 = vadd.f32 1.0, %v3221_v53  ;;  %v3223_v31 = vpop.eup %3222 }
 0x7ba   : > { %v2976_v18 = vadd.f32 %v2975_v5, %v2139_v13 }
 0x7bb   : > { %3234 = vrcp.f32 %v2107_v46  ;;  %v1239_v14 = vpop.permute.xlu1 %1238 }
 0x7bc   : > { %v3225_v41 = vpop.eup %3224  ;;  %3236 = vtanh.f32 %v2066_v35  ;;  %v1703_v26 = vpop.permute.xlu0 %1702 }
 0x7bd   : > { %v3227_v56 = vpop.eup %3226  ;;  %v2108_v58 = vadd.f32 1.0, %v3225_v41  ;;  %v2984_v16 = vadd.f32 %v1703_v26, %v1234_v0  ;;  %v3241_v41 = vld [vmem:[%s3450_s30] sm:$0xf] }
 0x7be   : > { %v2117_v55 = vmul.f32 %v3227_v56, %v3223_v31  ;;  %v3229_v61 = vpop.eup %3228 }
 0x7bf   : > { %3238 = vrcp.f32 %v2108_v58  ;;  %v1708_v15 = vpop.permute.xlu1 %1707 }
 0x7c0   : > { %v2981_v47 = vadd.f32 %v1708_v15, %v1239_v14  ;;  %v2144_v43 = vpop.permute.xlu0 %2143 }
 0x7c1   : > { %v3231_v23 = vpop.eup %3230  ;;  %v2985_v51 = vadd.f32 %v2984_v16, %v2144_v43 }
 0x7c2   : > { %v2118_v62 = vmul.f32 %v3231_v23, %v3229_v61  ;;  %v3233_v63 = vpop.eup %3232 }
 0x7c3   : > { %v2149_v35 = vpop.permute.xlu1 %2148 }
 0x7c4   : > { %v2957_v34 = vpack.c.bf16 %v2118_v62, %v2117_v55  ;;  %v2982_v50 = vadd.f32 %v2981_v47, %v2149_v35  ;;  %v2261_v52 = vpop.permute.xlu0 %2260 }
 0x7c5   : > { %v3235_v1 = vpop.eup %3234 }
 0x7c6   : > { %2958 = vmatprep.subr.bf16.mxu0 %v2957_v34  ;;  %v2119_v28 = vmul.f32 %v3235_v1, %v3233_v63  ;;  %v3237_v44 = vpop.eup %3236 }
 0x7c7   : > { %2960 = vmatpush3.bf16.msra.mxu0 %v2957_v34 }
 0x7c9   : > { %v3239_v45 = vpop.eup %3238 }
 0x7ca   : > { %v2120_v60 = vmul.f32 %v3239_v45, %v3237_v44 }
 0x7cc   : > { %v2961_v49 = vpack.c.bf16 %v2120_v60, %v2119_v28 }
 0x7ce   : > { %2962 = vmatprep.subr.bf16.mxu0 %v2961_v49 }
 0x7cf   : > { %2964 = vmatpush3.bf16.msra.mxu0 %v2961_v49 }
 0x7d2   : > { %2807 = vmatmul.mubr.msk.f32.vlgmr.msra.gmra.mrb[12].mxu0 %vm1023_vm2, %v2577_v4 }
 0x7d3   : > { %2809 = vmatprep.mubr.msk.f32.mxu0 %vm1023_vm2, %v2578_v6 }
 0x7d6   : > { %2810 = vmatmul.mubr.msk.f32.gmra.mrb[14].mxu0 %vm1023_vm2, %v2579_v59 }
 0x8a5   : > { %v2808_v57 = vpop.f32.mrb[12].mxu0 }
 0x8a6   : > { %v2977_v48 = vadd.f32 %v2976_v18, %v2808_v57  ;;  %v2229_v33 = vpop.f32.mrb[13].mxu0 }
 0x8a7   : > { %v2980_v29 = vadd.f32 %v2979_v20, %v2229_v33 }
 0x8a8   : > { %v2253_v38 = vmul.f32 %v4001_v7, %v2977_v48 }
 0x8a9   : > { %v2252_v2 = vmul.f32 %v4001_v7, %v2980_v29  ;;  %v2811_v25 = vpop.f32.mrb[14].mxu0 }
 0x8aa   : > { %v2983_v11 = vadd.f32 %v2982_v50, %v2811_v25  ;;  %v2239_v37 = vpop.f32.mrb[15].mxu0 }
 0x8ab   : > { %v2966_v8 = vpack.c.bf16 %v2253_v38, %v2252_v2  ;;  %v2986_v30 = vadd.f32 %v2985_v51, %v2239_v37 }
 0x8ac   : > { %v2255_v40 = vmul.f32 %v4001_v7, %v2983_v11 }
 0x8ad   : > { %v2254_v21 = vmul.f32 %v4001_v7, %v2986_v30  ;;  %2967 = vmatpush3.bf16.msra.mxu1 %v2966_v8 }
 0x8ae   : > { %2968 = vmatprep.subr.bf16.mxu1 %v3307_v27 }
 0x8af   : > { %v2969_v36 = vpack.c.bf16 %v2255_v40, %v2254_v21 }
 0x8b1   : > { %2970 = vmatpush3.bf16.msra.mxu1 %v2969_v36 }
 0x8b4   : > { %2821 = vmatmul.mubr.msk.f32.vlgmr.msra.gmra.mrb[52].mxu1 %vm1023_vm2, %v2256_v32 }
 0x987   : > { %v2332_v19 = vpop.f32.mrb[52].mxu1 }
 0x988   : > { %v2333_v3 = vadd.f32 %v2332_v19, %v2261_v52  ;;  %v2822_v53 = vpop.f32.mrb[53].mxu1 }
 0x98a   : > { %v2336_v27 = vmul.f32 %v4001_v7, %v2333_v3 }
 0x98c   : > { %v2338_v46 = vadd.f32 %v2337_v42, %v2336_v27 }
 0x98e   : > { %v2340_v31 = vrot.slane %v2338_v46, 4 }
 0x990   : > { %v2342_v56 = vsel %vm406_vm1, %v3241_v41, %v2340_v31 }
 0x991   : > { %2343 = vst [vmem:[%s376_s12] sm:$0xff] %v2342_v56 }
 0x992   : > { %3255 = shalt.err (!%p3252_p3)
}
 0x993   : > { %s3256_s30 = scalar_lea.hbm %s4230_s27, 128  ;;  %s3260_s20 = scalar_lea.hbm %s4284_s10, 256 }
 0x994   : > { %p3257_p4 = scmp.ne.s32.totalorder %s4230_s27, %s3256_s30  ;;  %p3261_p9 = scmp.lt.u32.totalorder %s4230_s27, %s4284_s10 }
 0x995   : > { %p3262_p10 = scmp.lt.u32.totalorder %s3260_s20, %s3256_s30  ;;  %p3264_p12 = scmp.lt.u32.totalorder %s3256_s30, %s4230_s27 }
 0x996   : > { %p3258_p7 = pnand %p3257_p4, %p3412_p5 }
 0x997   : > { %p3263_p11 = por %p3262_p10, %p3261_p9 }
 0x998   : > { %p3259_p8 = pneg %p3258_p7 }
 0x999   : > { %p3265_p13 = por %p3264_p12, %p3263_p11 }
 0x99b   : > { %p3266_p0 = pnand %p3265_p13, %p3259_p8 }
 0x99d   : > { %3269 = shalt.err (!%p3266_p0)
}
 0x99e   : > { %2995 = dma.vmem_to_hbm [thread:$0]  (%p3412_p5), %s4232_s26, 128, %s4230_s27, %s2345_s28  }
 0x99f PF: > { %p3001_p1 = scmp.ge.s32.totalorder %s3304_s16, 2  ;;  %s2370_s21 = sand.u32 1, %s3292_s13  }
 0x9a0   : > { %s2371_s11 = scalar_lea.sflag [#allocation4], %s2370_s21 }
 0x9a1   : > { %p2998_p2 = pnand %p3001_p1, %p3416_p6 }
 0x9a3   : > { %3287 = dma.done.wait (!%p2998_p2), %s2371_s11, 128  }
 0x9a4   : > { %3289 = vsyncadd (!%p2998_p2), %s2371_s11, 4294967168  ;;  %s4301_s17 = sld [smem:[#allocation6_spill]]  ;;  %s4302_s15 = sld [smem:[#allocation7_spill]] }
 0x9a5   : > { %p20_p3 = scmp.ge.s32.totalorder %s3399_s19, 4   ;;  %s4303_s13 = smov %s3296_s14 }
 0x9a6   : > { %s4305_s16 = smov %s3399_s19 }
 0x9a7   :  { %22 = sbr.rel (!%p20_p3) target bundleno = 3 (0x3), region = 107 }
 0x9aa   : > { %s4304_s14 = smov %s4301_s17 }
 0x9ae   :  { %2376 = vsyncpa [#allocation4], 1 }
 0x9af   :  { %2378 = vsyncpa [#allocation4 + $0x1], 1 }

</bundles_post_ra>
